<compile_context>
chip_gen: v5e
topology: v5e:2x2
jax: 0.10.0
libtpu: 0.0.40
codegen_flags: <defaults>
</compile_context>

<pallas_src>
import functools
import math

import jax
import jax.numpy as jnp
from jax import lax
from jax.experimental import pallas as pl
from jax.experimental.pallas import tpu as pltpu

LN_EPS = 1e-6  # nn.LayerNorm(d_model, eps=1e-6) in the reference repo


def _layer_norm(x, gamma, beta, eps=LN_EPS):
    """LayerNorm over the last dim; statistics always in f32."""
    x = x.astype(jnp.float32)
    mean = jnp.mean(x, axis=-1, keepdims=True)
    var = jnp.mean(jnp.square(x - mean), axis=-1, keepdims=True)
    return (x - mean) * jax.lax.rsqrt(var + eps) * gamma.astype(jnp.float32) \
        + beta.astype(jnp.float32)


def decoder_layer_kernel(
    # inputs
    xq_ref, kts_ref, vts_ref, kte_ref, vte_ref,
    s_wq_ref, s_wo_ref, s_lng_ref, s_lnb_ref,
    c_wq_ref, c_wo_ref, c_lng_ref, c_lnb_ref,
    w1_ref, b1_ref, w2_ref, b2_ref, f_lng_ref, f_lnb_ref,
    # outputs (1 or 3 refs, depending on return_attns)
    *out_refs,
    n_head, d_k, d_v, return_attns):
    """One (batch, query-tile) grid step of the decoder layer."""
    if return_attns:
        out_ref, slf_attn_ref, enc_attn_ref = out_refs
    else:
        (out_ref,) = out_refs
        slf_attn_ref = enc_attn_ref = None

    dtype = xq_ref.dtype
    inv_temp = 1.0 / math.sqrt(d_k)

    def attention(q_in, wq_ref, wo_ref, kt_ref, vt_ref, lng_ref, lnb_ref,
                  attn_out_ref, residual_f32):
        # q_in: (tq, D) compute dtype; residual_f32: (tq, D) f32
        # One full-width Q projection (N = H*d_k keeps the MXU output lanes
        # dense); pre-scaled by 1/sqrt(d_k).
        q = (jnp.dot(q_in, wq_ref[...], preferred_element_type=jnp.float32)
             * inv_temp).astype(dtype)                          # (tq, H*d_k)

        o = residual_f32                                        # (tq, D) f32 accumulator
        # Fully-unrolled per-head loop: no head-major scratch, no masked
        # stores; probabilities go straight to the output ref and the context
        # is folded into `o` through the matching Wo rows.
        for h in range(n_head):
            q_h = q[:, h * d_k:(h + 1) * d_k]                   # in-register lane slice
            k_t = kt_ref[0, h]                                  # (d_k, S), lane-dense
            v_t = vt_ref[0, h]                                  # (d_v, S), lane-dense
            s = jnp.dot(q_h, k_t, preferred_element_type=jnp.float32)   # (tq, S) f32
            s_max = jnp.max(s, axis=-1, keepdims=True)
            e = jnp.exp(s - s_max)
            denom = jnp.sum(e, axis=-1, keepdims=True)
            p = e * pl.reciprocal(denom, approx=True)           # softmax (EUP recip)
            if attn_out_ref is not None:
                attn_out_ref[0, h] = p.astype(attn_out_ref.dtype)
            # context = p @ v  ==  A @ B^T against the lane-dense (d_v, S) value
            ctx = lax.dot_general(
                p.astype(dtype), v_t,
                dimension_numbers=(((1,), (1,)), ((), ())),
                preferred_element_type=jnp.float32)             # (tq, d_v)
            o = o + jnp.dot(ctx.astype(dtype),
                            wo_ref[h * d_v:(h + 1) * d_v, :],
                            preferred_element_type=jnp.float32)
        return _layer_norm(o, lng_ref[...], lnb_ref[...])       # (tq, D) f32

    x_q = xq_ref[0]                                             # (tq, D) compute dtype

    # ---- masked self-attention (mask=None path) ---------------------------
    a1 = attention(x_q, s_wq_ref, s_wo_ref, kts_ref, vts_ref,
                   s_lng_ref, s_lnb_ref, slf_attn_ref,
                   x_q.astype(jnp.float32))

    # ---- encoder-decoder attention ----------------------------------------
    a2 = attention(a1.astype(dtype), c_wq_ref, c_wo_ref, kte_ref, vte_ref,
                   c_lng_ref, c_lnb_ref, enc_attn_ref, a1)

    # ---- position-wise feed-forward ---------------------------------------
    hid = jnp.maximum(
        jnp.dot(a2.astype(dtype), w1_ref[...],
                preferred_element_type=jnp.float32) + b1_ref[...], 0.0)
    f = jnp.dot(hid.astype(dtype), w2_ref[...],
                preferred_element_type=jnp.float32) + b2_ref[...] + a2
    out_ref[0] = _layer_norm(f, f_lng_ref[...], f_lnb_ref[...]).astype(out_ref.dtype)


def _rep_spec(shape):
    """Replicated (grid-constant) parameter block, single-buffered."""
    zeros = (0,) * len(shape)
    index_map = lambda b, q, _z=zeros: _z
    try:
        # Constant index_map -> never re-DMA'd after the first fill; a second
        # pipeline buffer would be pure VMEM waste (decisive on v7x's 64 MiB).
        return pl.BlockSpec(shape, index_map, pipeline_mode=pl.Buffered(1))
    except (TypeError, AttributeError):   # jax without BlockSpec.pipeline_mode
        return pl.BlockSpec(shape, index_map)


def _kv_heads_transposed(x, w, n_head, d_head, dtype):
    """(x @ w) laid out head-major + transposed: (B, H, d_head, S), lane-dense."""
    B, S, _ = x.shape
    y = jnp.dot(x, w).reshape(B, S, n_head, d_head)
    return y.transpose(0, 2, 3, 1).astype(dtype)


def decoder_layer(dec_input, enc_output, params, *, n_head, d_k, d_v,
                  block_q=None, return_attns=True):
    B, S_dec, D = dec_input.shape
    _, S_enc, _ = enc_output.shape
    d_inner = params["w1"].shape[1]
    dtype = dec_input.dtype

    if block_q is None:
        # 256 query rows fill the 256-wide MXU on v6e/v7x; pass 128 on v5e.
        block_q = S_dec
        for cand in (256, 128, 64, 32, 16, 8):
            if S_dec >= cand and S_dec % cand == 0:
                block_q = cand
                break
    assert S_dec % block_q == 0, "S_dec must be divisible by block_q"
    n_q = S_dec // block_q

    # K/V for both attentions projected once outside the kernel (plain XLA),
    # head-major transposed so S sits on the lane axis (no <128-lane padding).
    kt_self = _kv_heads_transposed(dec_input, params["s_wk"], n_head, d_k, dtype)
    vt_self = _kv_heads_transposed(dec_input, params["s_wv"], n_head, d_v, dtype)
    kt_enc = _kv_heads_transposed(enc_output, params["c_wk"], n_head, d_k, dtype)
    vt_enc = _kv_heads_transposed(enc_output, params["c_wv"], n_head, d_v, dtype)

    weights = (params["s_wq"], params["s_wo"], params["s_ln_g"], params["s_ln_b"],
               params["c_wq"], params["c_wo"], params["c_ln_g"], params["c_ln_b"],
               params["w1"], params["b1"], params["w2"], params["b2"],
               params["f_ln_g"], params["f_ln_b"])

    in_specs = [
        pl.BlockSpec((1, block_q, D), lambda b, q: (b, q, 0)),             # query tile
        pl.BlockSpec((1, n_head, d_k, S_dec), lambda b, q: (b, 0, 0, 0)),  # self K^T
        pl.BlockSpec((1, n_head, d_v, S_dec), lambda b, q: (b, 0, 0, 0)),  # self V^T
        pl.BlockSpec((1, n_head, d_k, S_enc), lambda b, q: (b, 0, 0, 0)),  # enc  K^T
        pl.BlockSpec((1, n_head, d_v, S_enc), lambda b, q: (b, 0, 0, 0)),  # enc  V^T
    ] + [_rep_spec(w.shape) for w in weights]

    out_specs = [pl.BlockSpec((1, block_q, D), lambda b, q: (b, q, 0))]
    out_shape = [jax.ShapeDtypeStruct((B, S_dec, D), dtype)]
    if return_attns:
        out_specs += [
            pl.BlockSpec((1, n_head, block_q, S_dec), lambda b, q: (b, 0, q, 0)),
            pl.BlockSpec((1, n_head, block_q, S_enc), lambda b, q: (b, 0, q, 0)),
        ]
        out_shape += [
            jax.ShapeDtypeStruct((B, n_head, S_dec, S_dec), dtype),
            jax.ShapeDtypeStruct((B, n_head, S_dec, S_enc), dtype),
        ]

    # ---- VMEM accounting (per grid step) -> scoped-VMEM limit --------------
    isz = jnp.dtype(dtype).itemsize
    Hdk, Hdv = n_head * d_k, n_head * d_v
    est = 2 * 2 * block_q * D * isz                                   # q tile + out tile (x2 bufs)
    est += 2 * (S_dec + S_enc) * (Hdk + Hdv) * isz                    # K/V blocks (x2 bufs)
    if return_attns:
        est += 2 * n_head * block_q * (S_dec + S_enc) * isz           # attn-map blocks (x2 bufs)
    est += sum(int(w.size) * jnp.dtype(w.dtype).itemsize for w in weights)  # single-buffered
    est += 4 * 4 * block_q * max(S_dec, S_enc)                        # per-head f32 score/prob temps
    est += 4 * (2 * block_q * d_inner + 6 * block_q * D)              # FFN / LayerNorm f32 temps
    try:
        phys = int(pltpu.get_tpu_info().vmem_capacity_bytes)
    except Exception:
        phys = 64 * 1024 * 1024                                       # v7x floor
    vmem_limit = min(max(32 * 1024 * 1024, int(1.25 * est)), (phys * 9) // 10)

    kernel = functools.partial(decoder_layer_kernel, n_head=n_head, d_k=d_k,
                               d_v=d_v, return_attns=return_attns)

    grid_spec = pltpu.PrefetchScalarGridSpec(
        num_scalar_prefetch=0,
        grid=(B, n_q),
        in_specs=in_specs,
        out_specs=out_specs,
    )
    results = pl.pallas_call(
        kernel,
        grid_spec=grid_spec,
        out_shape=out_shape,
        compiler_params=pltpu.CompilerParams(
            # No cross-step carried state: both grid axes shard freely
            # (megacore on v5e/v6e, dual TensorCore on v7x).
            dimension_semantics=("parallel", "parallel"),
            vmem_limit_bytes=vmem_limit,
        ),
    )(dec_input, kt_self, vt_self, kt_enc, vt_enc, *weights)

    if return_attns:
        out, slf_attn, enc_attn = results
        return out, slf_attn, enc_attn
    (out,) = results
    return out, None, None


# ---------------------------------------------------------------------------
# Pure-JAX reference matching the PyTorch forward (eval mode, mask=None).
# ---------------------------------------------------------------------------
def _mha_ref(q_in, k_in, v_in, wq, wk, wv, wo, g, b, *, n_head, d_k, d_v):
    B, Sq, D = q_in.shape
    Sk = k_in.shape[1]
    q = (q_in @ wq).reshape(B, Sq, n_head, d_k).transpose(0, 2, 1, 3)
    k = (k_in @ wk).reshape(B, Sk, n_head, d_k).transpose(0, 2, 1, 3)
    v = (v_in @ wv).reshape(B, Sk, n_head, d_v).transpose(0, 2, 1, 3)
    s = jnp.einsum("bhqd,bhkd->bhqk", q, k) / math.sqrt(d_k)
    attn = jax.nn.softmax(s, axis=-1)
    ctx = jnp.einsum("bhqk,bhkd->bhqd", attn, v)
    ctx = ctx.transpose(0, 2, 1, 3).reshape(B, Sq, n_head * d_v)
    out = _layer_norm(ctx @ wo + q_in, g, b)
    return out, attn


def decoder_layer_ref(x, enc, p, *, n_head, d_k, d_v):
    a1, slf = _mha_ref(x, x, x, p["s_wq"], p["s_wk"], p["s_wv"], p["s_wo"],
                       p["s_ln_g"], p["s_ln_b"], n_head=n_head, d_k=d_k, d_v=d_v)
    a2, ca = _mha_ref(a1, enc, enc, p["c_wq"], p["c_wk"], p["c_wv"], p["c_wo"],
                      p["c_ln_g"], p["c_ln_b"], n_head=n_head, d_k=d_k, d_v=d_v)
    h = jax.nn.relu(a2 @ p["w1"] + p["b1"])
    f = h @ p["w2"] + p["b2"] + a2
    out = _layer_norm(f, p["f_ln_g"], p["f_ln_b"])
    return out, slf, ca


def init_params(key, d_model, d_inner, n_head, d_k, d_v):
    ks = jax.random.split(key, 18)
    s = 0.1

    def nrm(k, shape):
        return s * jax.random.normal(k, shape, jnp.float32)

    return {
        "s_wq": nrm(ks[0], (d_model, n_head * d_k)),
        "s_wk": nrm(ks[1], (d_model, n_head * d_k)),
        "s_wv": nrm(ks[2], (d_model, n_head * d_v)),
        "s_wo": nrm(ks[3], (n_head * d_v, d_model)),
        "s_ln_g": 1.0 + nrm(ks[4], (1, d_model)),
        "s_ln_b": nrm(ks[5], (1, d_model)),
        "c_wq": nrm(ks[6], (d_model, n_head * d_k)),
        "c_wk": nrm(ks[7], (d_model, n_head * d_k)),
        "c_wv": nrm(ks[8], (d_model, n_head * d_v)),
        "c_wo": nrm(ks[9], (n_head * d_v, d_model)),
        "c_ln_g": 1.0 + nrm(ks[10], (1, d_model)),
        "c_ln_b": nrm(ks[11], (1, d_model)),
        "w1": nrm(ks[12], (d_model, d_inner)),
        "b1": nrm(ks[13], (1, d_inner)),
        "w2": nrm(ks[14], (d_inner, d_model)),
        "b2": nrm(ks[15], (1, d_model)),
        "f_ln_g": 1.0 + nrm(ks[16], (1, d_model)),
        "f_ln_b": nrm(ks[17], (1, d_model)),
    }


if __name__ == "__main__":
    # small, module-consistent shapes (2 query tiles to exercise the S-tiling)
    B = 2
    S_dec, S_enc = 16, 16
    d_model, d_inner, n_head, d_k, d_v = 32, 64, 4, 8, 8
    block_q = 8

    root = jax.random.PRNGKey(0)
    kx, ke, kp = jax.random.split(root, 3)
    x = jax.random.normal(kx, (B, S_dec, d_model), jnp.float32)
    enc = jax.random.normal(ke, (B, S_enc, d_model), jnp.float32)
    params = init_params(kp, d_model, d_inner, n_head, d_k, d_v)

    out, slf_attn, enc_attn = decoder_layer(
        x, enc, params, n_head=n_head, d_k=d_k, d_v=d_v, block_q=block_q)
    out = jax.block_until_ready(out)
    slf_attn = jax.block_until_ready(slf_attn)
    enc_attn = jax.block_until_ready(enc_attn)

    out_r, slf_r, enc_r = decoder_layer_ref(
        x, enc, params, n_head=n_head, d_k=d_k, d_v=d_v)

    assert out.shape == (B, S_dec, d_model)
    assert slf_attn.shape == (B, n_head, S_dec, S_dec)
    assert enc_attn.shape == (B, n_head, S_dec, S_enc)
    # approx EUP reciprocal in the softmax -> slightly looser tolerance
    assert jnp.allclose(out, out_r, atol=2e-3, rtol=2e-3), "output mismatch"
    assert jnp.allclose(slf_attn, slf_r, atol=2e-3, rtol=2e-3), "self-attn mismatch"
    assert jnp.allclose(enc_attn, enc_r, atol=2e-3, rtol=2e-3), "enc-attn mismatch"

    # attention-map-free fast path (drops the dominant HBM writeback traffic)
    out_na, _, _ = decoder_layer(
        x, enc, params, n_head=n_head, d_k=d_k, d_v=d_v, block_q=block_q,
        return_attns=False)
    out_na = jax.block_until_ready(out_na)
    assert jnp.allclose(out_na, out_r, atol=2e-3, rtol=2e-3), "no-attn output mismatch"

    print("KERNEL_OK")
</pallas_src>

<mosaic_0001>
module attributes {stable_mosaic.version = 11 : i64} {
  func.func @decoder_layer_kernel(%arg0: i32, %arg1: i32, %arg2: memref<1x8x32xf32, #tpu.memory_space<vmem>>, %arg3: memref<1x4x8x16xf32, #tpu.memory_space<vmem>>, %arg4: memref<1x4x8x16xf32, #tpu.memory_space<vmem>>, %arg5: memref<1x4x8x16xf32, #tpu.memory_space<vmem>>, %arg6: memref<1x4x8x16xf32, #tpu.memory_space<vmem>>, %arg7: memref<32x32xf32, #tpu.memory_space<vmem>>, %arg8: memref<32x32xf32, #tpu.memory_space<vmem>>, %arg9: memref<1x32xf32, #tpu.memory_space<vmem>>, %arg10: memref<1x32xf32, #tpu.memory_space<vmem>>, %arg11: memref<32x32xf32, #tpu.memory_space<vmem>>, %arg12: memref<32x32xf32, #tpu.memory_space<vmem>>, %arg13: memref<1x32xf32, #tpu.memory_space<vmem>>, %arg14: memref<1x32xf32, #tpu.memory_space<vmem>>, %arg15: memref<32x64xf32, #tpu.memory_space<vmem>>, %arg16: memref<1x64xf32, #tpu.memory_space<vmem>>, %arg17: memref<64x32xf32, #tpu.memory_space<vmem>>, %arg18: memref<1x32xf32, #tpu.memory_space<vmem>>, %arg19: memref<1x32xf32, #tpu.memory_space<vmem>>, %arg20: memref<1x32xf32, #tpu.memory_space<vmem>>, %arg21: memref<1x8x32xf32, #tpu.memory_space<vmem>>, %arg22: memref<1x4x8x16xf32, #tpu.memory_space<vmem>>, %arg23: memref<1x4x8x16xf32, #tpu.memory_space<vmem>>) attributes {dimension_semantics = [#tpu.dimension_semantics<parallel>, #tpu.dimension_semantics<parallel>], iteration_bounds = array<i64: 2, 2>, scalar_prefetch = 0 : i64, scratch_operands = 0 : i64, tpu.core_type = #tpu.core_type<tc>, window_params = [{transform_indices = @transform_0, window_bounds = array<i64: 1, 8, 32>}, {transform_indices = @transform_1, window_bounds = array<i64: 1, 4, 8, 16>}, {transform_indices = @transform_2, window_bounds = array<i64: 1, 4, 8, 16>}, {transform_indices = @transform_3, window_bounds = array<i64: 1, 4, 8, 16>}, {transform_indices = @transform_4, window_bounds = array<i64: 1, 4, 8, 16>}, {pipeline_mode = #tpu.pipeline_mode<synchronous>, transform_indices = @transform_5, window_bounds = array<i64: 32, 32>}, {pipeline_mode = #tpu.pipeline_mode<synchronous>, transform_indices = @transform_6, window_bounds = array<i64: 32, 32>}, {pipeline_mode = #tpu.pipeline_mode<synchronous>, transform_indices = @transform_7, window_bounds = array<i64: 1, 32>}, {pipeline_mode = #tpu.pipeline_mode<synchronous>, transform_indices = @transform_8, window_bounds = array<i64: 1, 32>}, {pipeline_mode = #tpu.pipeline_mode<synchronous>, transform_indices = @transform_9, window_bounds = array<i64: 32, 32>}, {pipeline_mode = #tpu.pipeline_mode<synchronous>, transform_indices = @transform_10, window_bounds = array<i64: 32, 32>}, {pipeline_mode = #tpu.pipeline_mode<synchronous>, transform_indices = @transform_11, window_bounds = array<i64: 1, 32>}, {pipeline_mode = #tpu.pipeline_mode<synchronous>, transform_indices = @transform_12, window_bounds = array<i64: 1, 32>}, {pipeline_mode = #tpu.pipeline_mode<synchronous>, transform_indices = @transform_13, window_bounds = array<i64: 32, 64>}, {pipeline_mode = #tpu.pipeline_mode<synchronous>, transform_indices = @transform_14, window_bounds = array<i64: 1, 64>}, {pipeline_mode = #tpu.pipeline_mode<synchronous>, transform_indices = @transform_15, window_bounds = array<i64: 64, 32>}, {pipeline_mode = #tpu.pipeline_mode<synchronous>, transform_indices = @transform_16, window_bounds = array<i64: 1, 32>}, {pipeline_mode = #tpu.pipeline_mode<synchronous>, transform_indices = @transform_17, window_bounds = array<i64: 1, 32>}, {pipeline_mode = #tpu.pipeline_mode<synchronous>, transform_indices = @transform_18, window_bounds = array<i64: 1, 32>}, {transform_indices = @transform_19, window_bounds = array<i64: 1, 8, 32>}, {transform_indices = @transform_20, window_bounds = array<i64: 1, 4, 8, 16>}, {transform_indices = @transform_21, window_bounds = array<i64: 1, 4, 8, 16>}]} {
    %c0 = arith.constant 0 : index
    %c0_0 = arith.constant 0 : index
    %c0_1 = arith.constant 0 : index
    %0 = vector.load %arg2[%c0, %c0_0, %c0_1] : memref<1x8x32xf32, #tpu.memory_space<vmem>>, vector<1x8x32xf32>
    %1 = vector.shape_cast %0 : vector<1x8x32xf32> to vector<8x32xf32>
    %c0_2 = arith.constant 0 : index
    %c0_3 = arith.constant 0 : index
    %2 = vector.load %arg7[%c0_2, %c0_3] : memref<32x32xf32, #tpu.memory_space<vmem>>, vector<32x32xf32>
    %cst = arith.constant dense<0.000000e+00> : vector<8x32xf32>
    %3 = tpu.matmul %1, %2, %cst {dimension_numbers = #tpu.dot_dimension_numbers<[1], [0], [0], [1], [0, 0, 1, 1], [], []>} : vector<8x32xf32>, vector<32x32xf32>, vector<8x32xf32> -> vector<8x32xf32>
    %cst_4 = arith.constant 0.353553385 : f32
    %4 = vector.broadcast %cst_4 : f32 to vector<8x32xf32>
    %5 = arith.mulf %3, %4 : vector<8x32xf32>
    %6 = vector.extract_strided_slice %5 {offsets = [0, 0], sizes = [8, 8], strides = [1, 1]} : vector<8x32xf32> to vector<8x8xf32>
    %c0_5 = arith.constant 0 : index
    %c0_6 = arith.constant 0 : index
    %c0_7 = arith.constant 0 : index
    %c0_8 = arith.constant 0 : index
    %7 = vector.load %arg3[%c0_5, %c0_6, %c0_7, %c0_8] : memref<1x4x8x16xf32, #tpu.memory_space<vmem>>, vector<1x1x8x16xf32>
    %8 = vector.shape_cast %7 : vector<1x1x8x16xf32> to vector<8x16xf32>
    %c0_9 = arith.constant 0 : index
    %c0_10 = arith.constant 0 : index
    %c0_11 = arith.constant 0 : index
    %c0_12 = arith.constant 0 : index
    %9 = vector.load %arg4[%c0_9, %c0_10, %c0_11, %c0_12] : memref<1x4x8x16xf32, #tpu.memory_space<vmem>>, vector<1x1x8x16xf32>
    %10 = vector.shape_cast %9 : vector<1x1x8x16xf32> to vector<8x16xf32>
    %cst_13 = arith.constant dense<0.000000e+00> : vector<8x16xf32>
    %11 = tpu.matmul %6, %8, %cst_13 {dimension_numbers = #tpu.dot_dimension_numbers<[1], [0], [0], [1], [0, 0, 1, 1], [], []>} : vector<8x8xf32>, vector<8x16xf32>, vector<8x16xf32> -> vector<8x16xf32>
    %cst_14 = arith.constant dense<0xFF800000> : vector<8xf32>
    %12 = vector.multi_reduction <maximumf>, %11, %cst_14 [1] : vector<8x16xf32> to vector<8xf32>
    %13 = vector.shape_cast %12 : vector<8xf32> to vector<8x1xf32>
    %14 = vector.broadcast %13 : vector<8x1xf32> to vector<8x16xf32>
    %15 = arith.subf %11, %14 : vector<8x16xf32>
    %16 = math.exp %15 : vector<8x16xf32>
    %cst_15 = arith.constant dense<0.000000e+00> : vector<8xf32>
    %17 = vector.multi_reduction <add>, %16, %cst_15 [1] : vector<8x16xf32> to vector<8xf32>
    %18 = vector.shape_cast %17 : vector<8xf32> to vector<8x1xf32>
    %19 = tpu.reciprocal %18 {approx = true} : vector<8x1xf32> -> vector<8x1xf32>
    %20 = vector.broadcast %19 : vector<8x1xf32> to vector<8x16xf32>
    %21 = arith.mulf %16, %20 : vector<8x16xf32>
    %c0_16 = arith.constant 0 : index
    %c0_17 = arith.constant 0 : index
    %c0_18 = arith.constant 0 : index
    %c0_19 = arith.constant 0 : index
    %22 = vector.load %arg22[%c0_16, %c0_17, %c0_18, %c0_19] : memref<1x4x8x16xf32, #tpu.memory_space<vmem>>, vector<1x1x8x16xf32>
    %23 = vector.shape_cast %22 : vector<1x1x8x16xf32> to vector<8x16xf32>
    %24 = vector.shape_cast %21 : vector<8x16xf32> to vector<1x1x8x16xf32>
    tpu.vector_store %arg22[%c0_16, %c0_17, %c0_18, %c0_19], %24 {strides = array<i32>} : memref<1x4x8x16xf32, #tpu.memory_space<vmem>>, vector<1x1x8x16xf32>,
    %cst_20 = arith.constant dense<0.000000e+00> : vector<8x8xf32>
    %25 = tpu.matmul %21, %10, %cst_20 {dimension_numbers = #tpu.dot_dimension_numbers<[1], [1], [0], [0], [0, 0, 1, 0], [], []>} : vector<8x16xf32>, vector<8x16xf32>, vector<8x8xf32> -> vector<8x8xf32>
    %c0_21 = arith.constant 0 : index
    %c0_22 = arith.constant 0 : index
    %26 = vector.load %arg8[%c0_21, %c0_22] : memref<32x32xf32, #tpu.memory_space<vmem>>, vector<8x32xf32>
    %cst_23 = arith.constant dense<0.000000e+00> : vector<8x32xf32>
    %27 = tpu.matmul %25, %26, %cst_23 {dimension_numbers = #tpu.dot_dimension_numbers<[1], [0], [0], [1], [0, 0, 1, 1], [], []>} : vector<8x8xf32>, vector<8x32xf32>, vector<8x32xf32> -> vector<8x32xf32>
    %28 = arith.addf %1, %27 : vector<8x32xf32>
    %29 = vector.extract_strided_slice %5 {offsets = [0, 8], sizes = [8, 8], strides = [1, 1]} : vector<8x32xf32> to vector<8x8xf32>
    %c0_24 = arith.constant 0 : index
    %c1 = arith.constant 1 : index
    %c0_25 = arith.constant 0 : index
    %c0_26 = arith.constant 0 : index
    %30 = vector.load %arg3[%c0_24, %c1, %c0_25, %c0_26] : memref<1x4x8x16xf32, #tpu.memory_space<vmem>>, vector<1x1x8x16xf32>
    %31 = vector.shape_cast %30 : vector<1x1x8x16xf32> to vector<8x16xf32>
    %c0_27 = arith.constant 0 : index
    %c1_28 = arith.constant 1 : index
    %c0_29 = arith.constant 0 : index
    %c0_30 = arith.constant 0 : index
    %32 = vector.load %arg4[%c0_27, %c1_28, %c0_29, %c0_30] : memref<1x4x8x16xf32, #tpu.memory_space<vmem>>, vector<1x1x8x16xf32>
    %33 = vector.shape_cast %32 : vector<1x1x8x16xf32> to vector<8x16xf32>
    %cst_31 = arith.constant dense<0.000000e+00> : vector<8x16xf32>
    %34 = tpu.matmul %29, %31, %cst_31 {dimension_numbers = #tpu.dot_dimension_numbers<[1], [0], [0], [1], [0, 0, 1, 1], [], []>} : vector<8x8xf32>, vector<8x16xf32>, vector<8x16xf32> -> vector<8x16xf32>
    %cst_32 = arith.constant dense<0xFF800000> : vector<8xf32>
    %35 = vector.multi_reduction <maximumf>, %34, %cst_32 [1] : vector<8x16xf32> to vector<8xf32>
    %36 = vector.shape_cast %35 : vector<8xf32> to vector<8x1xf32>
    %37 = vector.broadcast %36 : vector<8x1xf32> to vector<8x16xf32>
    %38 = arith.subf %34, %37 : vector<8x16xf32>
    %39 = math.exp %38 : vector<8x16xf32>
    %cst_33 = arith.constant dense<0.000000e+00> : vector<8xf32>
    %40 = vector.multi_reduction <add>, %39, %cst_33 [1] : vector<8x16xf32> to vector<8xf32>
    %41 = vector.shape_cast %40 : vector<8xf32> to vector<8x1xf32>
    %42 = tpu.reciprocal %41 {approx = true} : vector<8x1xf32> -> vector<8x1xf32>
    %43 = vector.broadcast %42 : vector<8x1xf32> to vector<8x16xf32>
    %44 = arith.mulf %39, %43 : vector<8x16xf32>
    %c0_34 = arith.constant 0 : index
    %c1_35 = arith.constant 1 : index
    %c0_36 = arith.constant 0 : index
    %c0_37 = arith.constant 0 : index
    %45 = vector.load %arg22[%c0_34, %c1_35, %c0_36, %c0_37] : memref<1x4x8x16xf32, #tpu.memory_space<vmem>>, vector<1x1x8x16xf32>
    %46 = vector.shape_cast %45 : vector<1x1x8x16xf32> to vector<8x16xf32>
    %47 = vector.shape_cast %44 : vector<8x16xf32> to vector<1x1x8x16xf32>
    tpu.vector_store %arg22[%c0_34, %c1_35, %c0_36, %c0_37], %47 {strides = array<i32>} : memref<1x4x8x16xf32, #tpu.memory_space<vmem>>, vector<1x1x8x16xf32>,
    %cst_38 = arith.constant dense<0.000000e+00> : vector<8x8xf32>
    %48 = tpu.matmul %44, %33, %cst_38 {dimension_numbers = #tpu.dot_dimension_numbers<[1], [1], [0], [0], [0, 0, 1, 0], [], []>} : vector<8x16xf32>, vector<8x16xf32>, vector<8x8xf32> -> vector<8x8xf32>
    %c8 = arith.constant 8 : index
    %c0_39 = arith.constant 0 : index
    %49 = vector.load %arg8[%c8, %c0_39] : memref<32x32xf32, #tpu.memory_space<vmem>>, vector<8x32xf32>
    %cst_40 = arith.constant dense<0.000000e+00> : vector<8x32xf32>
    %50 = tpu.matmul %48, %49, %cst_40 {dimension_numbers = #tpu.dot_dimension_numbers<[1], [0], [0], [1], [0, 0, 1, 1], [], []>} : vector<8x8xf32>, vector<8x32xf32>, vector<8x32xf32> -> vector<8x32xf32>
    %51 = arith.addf %28, %50 : vector<8x32xf32>
    %52 = vector.extract_strided_slice %5 {offsets = [0, 16], sizes = [8, 8], strides = [1, 1]} : vector<8x32xf32> to vector<8x8xf32>
    %c0_41 = arith.constant 0 : index
    %c2 = arith.constant 2 : index
    %c0_42 = arith.constant 0 : index
    %c0_43 = arith.constant 0 : index
    %53 = vector.load %arg3[%c0_41, %c2, %c0_42, %c0_43] : memref<1x4x8x16xf32, #tpu.memory_space<vmem>>, vector<1x1x8x16xf32>
    %54 = vector.shape_cast %53 : vector<1x1x8x16xf32> to vector<8x16xf32>
    %c0_44 = arith.constant 0 : index
    %c2_45 = arith.constant 2 : index
    %c0_46 = arith.constant 0 : index
    %c0_47 = arith.constant 0 : index
    %55 = vector.load %arg4[%c0_44, %c2_45, %c0_46, %c0_47] : memref<1x4x8x16xf32, #tpu.memory_space<vmem>>, vector<1x1x8x16xf32>
    %56 = vector.shape_cast %55 : vector<1x1x8x16xf32> to vector<8x16xf32>
    %cst_48 = arith.constant dense<0.000000e+00> : vector<8x16xf32>
    %57 = tpu.matmul %52, %54, %cst_48 {dimension_numbers = #tpu.dot_dimension_numbers<[1], [0], [0], [1], [0, 0, 1, 1], [], []>} : vector<8x8xf32>, vector<8x16xf32>, vector<8x16xf32> -> vector<8x16xf32>
    %cst_49 = arith.constant dense<0xFF800000> : vector<8xf32>
    %58 = vector.multi_reduction <maximumf>, %57, %cst_49 [1] : vector<8x16xf32> to vector<8xf32>
    %59 = vector.shape_cast %58 : vector<8xf32> to vector<8x1xf32>
    %60 = vector.broadcast %59 : vector<8x1xf32> to vector<8x16xf32>
    %61 = arith.subf %57, %60 : vector<8x16xf32>
    %62 = math.exp %61 : vector<8x16xf32>
    %cst_50 = arith.constant dense<0.000000e+00> : vector<8xf32>
    %63 = vector.multi_reduction <add>, %62, %cst_50 [1] : vector<8x16xf32> to vector<8xf32>
    %64 = vector.shape_cast %63 : vector<8xf32> to vector<8x1xf32>
    %65 = tpu.reciprocal %64 {approx = true} : vector<8x1xf32> -> vector<8x1xf32>
    %66 = vector.broadcast %65 : vector<8x1xf32> to vector<8x16xf32>
    %67 = arith.mulf %62, %66 : vector<8x16xf32>
    %c0_51 = arith.constant 0 : index
    %c2_52 = arith.constant 2 : index
    %c0_53 = arith.constant 0 : index
    %c0_54 = arith.constant 0 : index
    %68 = vector.load %arg22[%c0_51, %c2_52, %c0_53, %c0_54] : memref<1x4x8x16xf32, #tpu.memory_space<vmem>>, vector<1x1x8x16xf32>
    %69 = vector.shape_cast %68 : vector<1x1x8x16xf32> to vector<8x16xf32>
    %70 = vector.shape_cast %67 : vector<8x16xf32> to vector<1x1x8x16xf32>
    tpu.vector_store %arg22[%c0_51, %c2_52, %c0_53, %c0_54], %70 {strides = array<i32>} : memref<1x4x8x16xf32, #tpu.memory_space<vmem>>, vector<1x1x8x16xf32>,
    %cst_55 = arith.constant dense<0.000000e+00> : vector<8x8xf32>
    %71 = tpu.matmul %67, %56, %cst_55 {dimension_numbers = #tpu.dot_dimension_numbers<[1], [1], [0], [0], [0, 0, 1, 0], [], []>} : vector<8x16xf32>, vector<8x16xf32>, vector<8x8xf32> -> vector<8x8xf32>
    %c16 = arith.constant 16 : index
    %c0_56 = arith.constant 0 : index
    %72 = vector.load %arg8[%c16, %c0_56] : memref<32x32xf32, #tpu.memory_space<vmem>>, vector<8x32xf32>
    %cst_57 = arith.constant dense<0.000000e+00> : vector<8x32xf32>
    %73 = tpu.matmul %71, %72, %cst_57 {dimension_numbers = #tpu.dot_dimension_numbers<[1], [0], [0], [1], [0, 0, 1, 1], [], []>} : vector<8x8xf32>, vector<8x32xf32>, vector<8x32xf32> -> vector<8x32xf32>
    %74 = arith.addf %51, %73 : vector<8x32xf32>
    %75 = vector.extract_strided_slice %5 {offsets = [0, 24], sizes = [8, 8], strides = [1, 1]} : vector<8x32xf32> to vector<8x8xf32>
    %c0_58 = arith.constant 0 : index
    %c3 = arith.constant 3 : index
    %c0_59 = arith.constant 0 : index
    %c0_60 = arith.constant 0 : index
    %76 = vector.load %arg3[%c0_58, %c3, %c0_59, %c0_60] : memref<1x4x8x16xf32, #tpu.memory_space<vmem>>, vector<1x1x8x16xf32>
    %77 = vector.shape_cast %76 : vector<1x1x8x16xf32> to vector<8x16xf32>
    %c0_61 = arith.constant 0 : index
    %c3_62 = arith.constant 3 : index
    %c0_63 = arith.constant 0 : index
    %c0_64 = arith.constant 0 : index
    %78 = vector.load %arg4[%c0_61, %c3_62, %c0_63, %c0_64] : memref<1x4x8x16xf32, #tpu.memory_space<vmem>>, vector<1x1x8x16xf32>
    %79 = vector.shape_cast %78 : vector<1x1x8x16xf32> to vector<8x16xf32>
    %cst_65 = arith.constant dense<0.000000e+00> : vector<8x16xf32>
    %80 = tpu.matmul %75, %77, %cst_65 {dimension_numbers = #tpu.dot_dimension_numbers<[1], [0], [0], [1], [0, 0, 1, 1], [], []>} : vector<8x8xf32>, vector<8x16xf32>, vector<8x16xf32> -> vector<8x16xf32>
    %cst_66 = arith.constant dense<0xFF800000> : vector<8xf32>
    %81 = vector.multi_reduction <maximumf>, %80, %cst_66 [1] : vector<8x16xf32> to vector<8xf32>
    %82 = vector.shape_cast %81 : vector<8xf32> to vector<8x1xf32>
    %83 = vector.broadcast %82 : vector<8x1xf32> to vector<8x16xf32>
    %84 = arith.subf %80, %83 : vector<8x16xf32>
    %85 = math.exp %84 : vector<8x16xf32>
    %cst_67 = arith.constant dense<0.000000e+00> : vector<8xf32>
    %86 = vector.multi_reduction <add>, %85, %cst_67 [1] : vector<8x16xf32> to vector<8xf32>
    %87 = vector.shape_cast %86 : vector<8xf32> to vector<8x1xf32>
    %88 = tpu.reciprocal %87 {approx = true} : vector<8x1xf32> -> vector<8x1xf32>
    %89 = vector.broadcast %88 : vector<8x1xf32> to vector<8x16xf32>
    %90 = arith.mulf %85, %89 : vector<8x16xf32>
    %c0_68 = arith.constant 0 : index
    %c3_69 = arith.constant 3 : index
    %c0_70 = arith.constant 0 : index
    %c0_71 = arith.constant 0 : index
    %91 = vector.load %arg22[%c0_68, %c3_69, %c0_70, %c0_71] : memref<1x4x8x16xf32, #tpu.memory_space<vmem>>, vector<1x1x8x16xf32>
    %92 = vector.shape_cast %91 : vector<1x1x8x16xf32> to vector<8x16xf32>
    %93 = vector.shape_cast %90 : vector<8x16xf32> to vector<1x1x8x16xf32>
    tpu.vector_store %arg22[%c0_68, %c3_69, %c0_70, %c0_71], %93 {strides = array<i32>} : memref<1x4x8x16xf32, #tpu.memory_space<vmem>>, vector<1x1x8x16xf32>,
    %cst_72 = arith.constant dense<0.000000e+00> : vector<8x8xf32>
    %94 = tpu.matmul %90, %79, %cst_72 {dimension_numbers = #tpu.dot_dimension_numbers<[1], [1], [0], [0], [0, 0, 1, 0], [], []>} : vector<8x16xf32>, vector<8x16xf32>, vector<8x8xf32> -> vector<8x8xf32>
    %c24 = arith.constant 24 : index
    %c0_73 = arith.constant 0 : index
    %95 = vector.load %arg8[%c24, %c0_73] : memref<32x32xf32, #tpu.memory_space<vmem>>, vector<8x32xf32>
    %cst_74 = arith.constant dense<0.000000e+00> : vector<8x32xf32>
    %96 = tpu.matmul %94, %95, %cst_74 {dimension_numbers = #tpu.dot_dimension_numbers<[1], [0], [0], [1], [0, 0, 1, 1], [], []>} : vector<8x8xf32>, vector<8x32xf32>, vector<8x32xf32> -> vector<8x32xf32>
    %97 = arith.addf %74, %96 : vector<8x32xf32>
    %c0_75 = arith.constant 0 : index
    %c0_76 = arith.constant 0 : index
    %98 = vector.load %arg9[%c0_75, %c0_76] : memref<1x32xf32, #tpu.memory_space<vmem>>, vector<1x32xf32>
    %c0_77 = arith.constant 0 : index
    %c0_78 = arith.constant 0 : index
    %99 = vector.load %arg10[%c0_77, %c0_78] : memref<1x32xf32, #tpu.memory_space<vmem>>, vector<1x32xf32>
    %cst_79 = arith.constant dense<0.000000e+00> : vector<8xf32>
    %100 = vector.multi_reduction <add>, %97, %cst_79 [1] : vector<8x32xf32> to vector<8xf32>
    %101 = vector.shape_cast %100 : vector<8xf32> to vector<8x1xf32>
    %cst_80 = arith.constant 3.200000e+01 : f32
    %102 = vector.broadcast %cst_80 : f32 to vector<8x1xf32>
    %103 = arith.divf %101, %102 : vector<8x1xf32>
    %104 = vector.broadcast %103 : vector<8x1xf32> to vector<8x32xf32>
    %105 = arith.subf %97, %104 : vector<8x32xf32>
    %106 = arith.mulf %105, %105 : vector<8x32xf32>
    %cst_81 = arith.constant dense<0.000000e+00> : vector<8xf32>
    %107 = vector.multi_reduction <add>, %106, %cst_81 [1] : vector<8x32xf32> to vector<8xf32>
    %108 = vector.shape_cast %107 : vector<8xf32> to vector<8x1xf32>
    %cst_82 = arith.constant 3.200000e+01 : f32
    %109 = vector.broadcast %cst_82 : f32 to vector<8x1xf32>
    %110 = arith.divf %108, %109 : vector<8x1xf32>
    %111 = vector.broadcast %103 : vector<8x1xf32> to vector<8x32xf32>
    %112 = arith.subf %97, %111 : vector<8x32xf32>
    %cst_83 = arith.constant 9.99999997E-7 : f32
    %113 = vector.broadcast %cst_83 : f32 to vector<8x1xf32>
    %114 = arith.addf %110, %113 : vector<8x1xf32>
    %115 = math.rsqrt %114 : vector<8x1xf32>
    %116 = vector.broadcast %115 : vector<8x1xf32> to vector<8x32xf32>
    %117 = arith.mulf %112, %116 : vector<8x32xf32>
    %118 = vector.broadcast %98 : vector<1x32xf32> to vector<8x32xf32>
    %119 = arith.mulf %117, %118 : vector<8x32xf32>
    %120 = vector.broadcast %99 : vector<1x32xf32> to vector<8x32xf32>
    %121 = arith.addf %119, %120 : vector<8x32xf32>
    %c0_84 = arith.constant 0 : index
    %c0_85 = arith.constant 0 : index
    %122 = vector.load %arg11[%c0_84, %c0_85] : memref<32x32xf32, #tpu.memory_space<vmem>>, vector<32x32xf32>
    %cst_86 = arith.constant dense<0.000000e+00> : vector<8x32xf32>
    %123 = tpu.matmul %121, %122, %cst_86 {dimension_numbers = #tpu.dot_dimension_numbers<[1], [0], [0], [1], [0, 0, 1, 1], [], []>} : vector<8x32xf32>, vector<32x32xf32>, vector<8x32xf32> -> vector<8x32xf32>
    %cst_87 = arith.constant 0.353553385 : f32
    %124 = vector.broadcast %cst_87 : f32 to vector<8x32xf32>
    %125 = arith.mulf %123, %124 : vector<8x32xf32>
    %126 = vector.extract_strided_slice %125 {offsets = [0, 0], sizes = [8, 8], strides = [1, 1]} : vector<8x32xf32> to vector<8x8xf32>
    %c0_88 = arith.constant 0 : index
    %c0_89 = arith.constant 0 : index
    %c0_90 = arith.constant 0 : index
    %c0_91 = arith.constant 0 : index
    %127 = vector.load %arg5[%c0_88, %c0_89, %c0_90, %c0_91] : memref<1x4x8x16xf32, #tpu.memory_space<vmem>>, vector<1x1x8x16xf32>
    %128 = vector.shape_cast %127 : vector<1x1x8x16xf32> to vector<8x16xf32>
    %c0_92 = arith.constant 0 : index
    %c0_93 = arith.constant 0 : index
    %c0_94 = arith.constant 0 : index
    %c0_95 = arith.constant 0 : index
    %129 = vector.load %arg6[%c0_92, %c0_93, %c0_94, %c0_95] : memref<1x4x8x16xf32, #tpu.memory_space<vmem>>, vector<1x1x8x16xf32>
    %130 = vector.shape_cast %129 : vector<1x1x8x16xf32> to vector<8x16xf32>
    %cst_96 = arith.constant dense<0.000000e+00> : vector<8x16xf32>
    %131 = tpu.matmul %126, %128, %cst_96 {dimension_numbers = #tpu.dot_dimension_numbers<[1], [0], [0], [1], [0, 0, 1, 1], [], []>} : vector<8x8xf32>, vector<8x16xf32>, vector<8x16xf32> -> vector<8x16xf32>
    %cst_97 = arith.constant dense<0xFF800000> : vector<8xf32>
    %132 = vector.multi_reduction <maximumf>, %131, %cst_97 [1] : vector<8x16xf32> to vector<8xf32>
    %133 = vector.shape_cast %132 : vector<8xf32> to vector<8x1xf32>
    %134 = vector.broadcast %133 : vector<8x1xf32> to vector<8x16xf32>
    %135 = arith.subf %131, %134 : vector<8x16xf32>
    %136 = math.exp %135 : vector<8x16xf32>
    %cst_98 = arith.constant dense<0.000000e+00> : vector<8xf32>
    %137 = vector.multi_reduction <add>, %136, %cst_98 [1] : vector<8x16xf32> to vector<8xf32>
    %138 = vector.shape_cast %137 : vector<8xf32> to vector<8x1xf32>
    %139 = tpu.reciprocal %138 {approx = true} : vector<8x1xf32> -> vector<8x1xf32>
    %140 = vector.broadcast %139 : vector<8x1xf32> to vector<8x16xf32>
    %141 = arith.mulf %136, %140 : vector<8x16xf32>
    %c0_99 = arith.constant 0 : index
    %c0_100 = arith.constant 0 : index
    %c0_101 = arith.constant 0 : index
    %c0_102 = arith.constant 0 : index
    %142 = vector.load %arg23[%c0_99, %c0_100, %c0_101, %c0_102] : memref<1x4x8x16xf32, #tpu.memory_space<vmem>>, vector<1x1x8x16xf32>
    %143 = vector.shape_cast %142 : vector<1x1x8x16xf32> to vector<8x16xf32>
    %144 = vector.shape_cast %141 : vector<8x16xf32> to vector<1x1x8x16xf32>
    tpu.vector_store %arg23[%c0_99, %c0_100, %c0_101, %c0_102], %144 {strides = array<i32>} : memref<1x4x8x16xf32, #tpu.memory_space<vmem>>, vector<1x1x8x16xf32>,
    %cst_103 = arith.constant dense<0.000000e+00> : vector<8x8xf32>
    %145 = tpu.matmul %141, %130, %cst_103 {dimension_numbers = #tpu.dot_dimension_numbers<[1], [1], [0], [0], [0, 0, 1, 0], [], []>} : vector<8x16xf32>, vector<8x16xf32>, vector<8x8xf32> -> vector<8x8xf32>
    %c0_104 = arith.constant 0 : index
    %c0_105 = arith.constant 0 : index
    %146 = vector.load %arg12[%c0_104, %c0_105] : memref<32x32xf32, #tpu.memory_space<vmem>>, vector<8x32xf32>
    %cst_106 = arith.constant dense<0.000000e+00> : vector<8x32xf32>
    %147 = tpu.matmul %145, %146, %cst_106 {dimension_numbers = #tpu.dot_dimension_numbers<[1], [0], [0], [1], [0, 0, 1, 1], [], []>} : vector<8x8xf32>, vector<8x32xf32>, vector<8x32xf32> -> vector<8x32xf32>
    %148 = arith.addf %121, %147 : vector<8x32xf32>
    %149 = vector.extract_strided_slice %125 {offsets = [0, 8], sizes = [8, 8], strides = [1, 1]} : vector<8x32xf32> to vector<8x8xf32>
    %c0_107 = arith.constant 0 : index
    %c1_108 = arith.constant 1 : index
    %c0_109 = arith.constant 0 : index
    %c0_110 = arith.constant 0 : index
    %150 = vector.load %arg5[%c0_107, %c1_108, %c0_109, %c0_110] : memref<1x4x8x16xf32, #tpu.memory_space<vmem>>, vector<1x1x8x16xf32>
    %151 = vector.shape_cast %150 : vector<1x1x8x16xf32> to vector<8x16xf32>
    %c0_111 = arith.constant 0 : index
    %c1_112 = arith.constant 1 : index
    %c0_113 = arith.constant 0 : index
    %c0_114 = arith.constant 0 : index
    %152 = vector.load %arg6[%c0_111, %c1_112, %c0_113, %c0_114] : memref<1x4x8x16xf32, #tpu.memory_space<vmem>>, vector<1x1x8x16xf32>
    %153 = vector.shape_cast %152 : vector<1x1x8x16xf32> to vector<8x16xf32>
    %cst_115 = arith.constant dense<0.000000e+00> : vector<8x16xf32>
    %154 = tpu.matmul %149, %151, %cst_115 {dimension_numbers = #tpu.dot_dimension_numbers<[1], [0], [0], [1], [0, 0, 1, 1], [], []>} : vector<8x8xf32>, vector<8x16xf32>, vector<8x16xf32> -> vector<8x16xf32>
    %cst_116 = arith.constant dense<0xFF800000> : vector<8xf32>
    %155 = vector.multi_reduction <maximumf>, %154, %cst_116 [1] : vector<8x16xf32> to vector<8xf32>
    %156 = vector.shape_cast %155 : vector<8xf32> to vector<8x1xf32>
    %157 = vector.broadcast %156 : vector<8x1xf32> to vector<8x16xf32>
    %158 = arith.subf %154, %157 : vector<8x16xf32>
    %159 = math.exp %158 : vector<8x16xf32>
    %cst_117 = arith.constant dense<0.000000e+00> : vector<8xf32>
    %160 = vector.multi_reduction <add>, %159, %cst_117 [1] : vector<8x16xf32> to vector<8xf32>
    %161 = vector.shape_cast %160 : vector<8xf32> to vector<8x1xf32>
    %162 = tpu.reciprocal %161 {approx = true} : vector<8x1xf32> -> vector<8x1xf32>
    %163 = vector.broadcast %162 : vector<8x1xf32> to vector<8x16xf32>
    %164 = arith.mulf %159, %163 : vector<8x16xf32>
    %c0_118 = arith.constant 0 : index
    %c1_119 = arith.constant 1 : index
    %c0_120 = arith.constant 0 : index
    %c0_121 = arith.constant 0 : index
    %165 = vector.load %arg23[%c0_118, %c1_119, %c0_120, %c0_121] : memref<1x4x8x16xf32, #tpu.memory_space<vmem>>, vector<1x1x8x16xf32>
    %166 = vector.shape_cast %165 : vector<1x1x8x16xf32> to vector<8x16xf32>
    %167 = vector.shape_cast %164 : vector<8x16xf32> to vector<1x1x8x16xf32>
    tpu.vector_store %arg23[%c0_118, %c1_119, %c0_120, %c0_121], %167 {strides = array<i32>} : memref<1x4x8x16xf32, #tpu.memory_space<vmem>>, vector<1x1x8x16xf32>,
    %cst_122 = arith.constant dense<0.000000e+00> : vector<8x8xf32>
    %168 = tpu.matmul %164, %153, %cst_122 {dimension_numbers = #tpu.dot_dimension_numbers<[1], [1], [0], [0], [0, 0, 1, 0], [], []>} : vector<8x16xf32>, vector<8x16xf32>, vector<8x8xf32> -> vector<8x8xf32>
    %c8_123 = arith.constant 8 : index
    %c0_124 = arith.constant 0 : index
    %169 = vector.load %arg12[%c8_123, %c0_124] : memref<32x32xf32, #tpu.memory_space<vmem>>, vector<8x32xf32>
    %cst_125 = arith.constant dense<0.000000e+00> : vector<8x32xf32>
    %170 = tpu.matmul %168, %169, %cst_125 {dimension_numbers = #tpu.dot_dimension_numbers<[1], [0], [0], [1], [0, 0, 1, 1], [], []>} : vector<8x8xf32>, vector<8x32xf32>, vector<8x32xf32> -> vector<8x32xf32>
    %171 = arith.addf %148, %170 : vector<8x32xf32>
    %172 = vector.extract_strided_slice %125 {offsets = [0, 16], sizes = [8, 8], strides = [1, 1]} : vector<8x32xf32> to vector<8x8xf32>
    %c0_126 = arith.constant 0 : index
    %c2_127 = arith.constant 2 : index
    %c0_128 = arith.constant 0 : index
    %c0_129 = arith.constant 0 : index
    %173 = vector.load %arg5[%c0_126, %c2_127, %c0_128, %c0_129] : memref<1x4x8x16xf32, #tpu.memory_space<vmem>>, vector<1x1x8x16xf32>
    %174 = vector.shape_cast %173 : vector<1x1x8x16xf32> to vector<8x16xf32>
    %c0_130 = arith.constant 0 : index
    %c2_131 = arith.constant 2 : index
    %c0_132 = arith.constant 0 : index
    %c0_133 = arith.constant 0 : index
    %175 = vector.load %arg6[%c0_130, %c2_131, %c0_132, %c0_133] : memref<1x4x8x16xf32, #tpu.memory_space<vmem>>, vector<1x1x8x16xf32>
    %176 = vector.shape_cast %175 : vector<1x1x8x16xf32> to vector<8x16xf32>
    %cst_134 = arith.constant dense<0.000000e+00> : vector<8x16xf32>
    %177 = tpu.matmul %172, %174, %cst_134 {dimension_numbers = #tpu.dot_dimension_numbers<[1], [0], [0], [1], [0, 0, 1, 1], [], []>} : vector<8x8xf32>, vector<8x16xf32>, vector<8x16xf32> -> vector<8x16xf32>
    %cst_135 = arith.constant dense<0xFF800000> : vector<8xf32>
    %178 = vector.multi_reduction <maximumf>, %177, %cst_135 [1] : vector<8x16xf32> to vector<8xf32>
    %179 = vector.shape_cast %178 : vector<8xf32> to vector<8x1xf32>
    %180 = vector.broadcast %179 : vector<8x1xf32> to vector<8x16xf32>
    %181 = arith.subf %177, %180 : vector<8x16xf32>
    %182 = math.exp %181 : vector<8x16xf32>
    %cst_136 = arith.constant dense<0.000000e+00> : vector<8xf32>
    %183 = vector.multi_reduction <add>, %182, %cst_136 [1] : vector<8x16xf32> to vector<8xf32>
    %184 = vector.shape_cast %183 : vector<8xf32> to vector<8x1xf32>
    %185 = tpu.reciprocal %184 {approx = true} : vector<8x1xf32> -> vector<8x1xf32>
    %186 = vector.broadcast %185 : vector<8x1xf32> to vector<8x16xf32>
    %187 = arith.mulf %182, %186 : vector<8x16xf32>
    %c0_137 = arith.constant 0 : index
    %c2_138 = arith.constant 2 : index
    %c0_139 = arith.constant 0 : index
    %c0_140 = arith.constant 0 : index
    %188 = vector.load %arg23[%c0_137, %c2_138, %c0_139, %c0_140] : memref<1x4x8x16xf32, #tpu.memory_space<vmem>>, vector<1x1x8x16xf32>
    %189 = vector.shape_cast %188 : vector<1x1x8x16xf32> to vector<8x16xf32>
    %190 = vector.shape_cast %187 : vector<8x16xf32> to vector<1x1x8x16xf32>
    tpu.vector_store %arg23[%c0_137, %c2_138, %c0_139, %c0_140], %190 {strides = array<i32>} : memref<1x4x8x16xf32, #tpu.memory_space<vmem>>, vector<1x1x8x16xf32>,
    %cst_141 = arith.constant dense<0.000000e+00> : vector<8x8xf32>
    %191 = tpu.matmul %187, %176, %cst_141 {dimension_numbers = #tpu.dot_dimension_numbers<[1], [1], [0], [0], [0, 0, 1, 0], [], []>} : vector<8x16xf32>, vector<8x16xf32>, vector<8x8xf32> -> vector<8x8xf32>
    %c16_142 = arith.constant 16 : index
    %c0_143 = arith.constant 0 : index
    %192 = vector.load %arg12[%c16_142, %c0_143] : memref<32x32xf32, #tpu.memory_space<vmem>>, vector<8x32xf32>
    %cst_144 = arith.constant dense<0.000000e+00> : vector<8x32xf32>
    %193 = tpu.matmul %191, %192, %cst_144 {dimension_numbers = #tpu.dot_dimension_numbers<[1], [0], [0], [1], [0, 0, 1, 1], [], []>} : vector<8x8xf32>, vector<8x32xf32>, vector<8x32xf32> -> vector<8x32xf32>
    %194 = arith.addf %171, %193 : vector<8x32xf32>
    %195 = vector.extract_strided_slice %125 {offsets = [0, 24], sizes = [8, 8], strides = [1, 1]} : vector<8x32xf32> to vector<8x8xf32>
    %c0_145 = arith.constant 0 : index
    %c3_146 = arith.constant 3 : index
    %c0_147 = arith.constant 0 : index
    %c0_148 = arith.constant 0 : index
    %196 = vector.load %arg5[%c0_145, %c3_146, %c0_147, %c0_148] : memref<1x4x8x16xf32, #tpu.memory_space<vmem>>, vector<1x1x8x16xf32>
    %197 = vector.shape_cast %196 : vector<1x1x8x16xf32> to vector<8x16xf32>
    %c0_149 = arith.constant 0 : index
    %c3_150 = arith.constant 3 : index
    %c0_151 = arith.constant 0 : index
    %c0_152 = arith.constant 0 : index
    %198 = vector.load %arg6[%c0_149, %c3_150, %c0_151, %c0_152] : memref<1x4x8x16xf32, #tpu.memory_space<vmem>>, vector<1x1x8x16xf32>
    %199 = vector.shape_cast %198 : vector<1x1x8x16xf32> to vector<8x16xf32>
    %cst_153 = arith.constant dense<0.000000e+00> : vector<8x16xf32>
    %200 = tpu.matmul %195, %197, %cst_153 {dimension_numbers = #tpu.dot_dimension_numbers<[1], [0], [0], [1], [0, 0, 1, 1], [], []>} : vector<8x8xf32>, vector<8x16xf32>, vector<8x16xf32> -> vector<8x16xf32>
    %cst_154 = arith.constant dense<0xFF800000> : vector<8xf32>
    %201 = vector.multi_reduction <maximumf>, %200, %cst_154 [1] : vector<8x16xf32> to vector<8xf32>
    %202 = vector.shape_cast %201 : vector<8xf32> to vector<8x1xf32>
    %203 = vector.broadcast %202 : vector<8x1xf32> to vector<8x16xf32>
    %204 = arith.subf %200, %203 : vector<8x16xf32>
    %205 = math.exp %204 : vector<8x16xf32>
    %cst_155 = arith.constant dense<0.000000e+00> : vector<8xf32>
    %206 = vector.multi_reduction <add>, %205, %cst_155 [1] : vector<8x16xf32> to vector<8xf32>
    %207 = vector.shape_cast %206 : vector<8xf32> to vector<8x1xf32>
    %208 = tpu.reciprocal %207 {approx = true} : vector<8x1xf32> -> vector<8x1xf32>
    %209 = vector.broadcast %208 : vector<8x1xf32> to vector<8x16xf32>
    %210 = arith.mulf %205, %209 : vector<8x16xf32>
    %c0_156 = arith.constant 0 : index
    %c3_157 = arith.constant 3 : index
    %c0_158 = arith.constant 0 : index
    %c0_159 = arith.constant 0 : index
    %211 = vector.load %arg23[%c0_156, %c3_157, %c0_158, %c0_159] : memref<1x4x8x16xf32, #tpu.memory_space<vmem>>, vector<1x1x8x16xf32>
    %212 = vector.shape_cast %211 : vector<1x1x8x16xf32> to vector<8x16xf32>
    %213 = vector.shape_cast %210 : vector<8x16xf32> to vector<1x1x8x16xf32>
    tpu.vector_store %arg23[%c0_156, %c3_157, %c0_158, %c0_159], %213 {strides = array<i32>} : memref<1x4x8x16xf32, #tpu.memory_space<vmem>>, vector<1x1x8x16xf32>,
    %cst_160 = arith.constant dense<0.000000e+00> : vector<8x8xf32>
    %214 = tpu.matmul %210, %199, %cst_160 {dimension_numbers = #tpu.dot_dimension_numbers<[1], [1], [0], [0], [0, 0, 1, 0], [], []>} : vector<8x16xf32>, vector<8x16xf32>, vector<8x8xf32> -> vector<8x8xf32>
    %c24_161 = arith.constant 24 : index
    %c0_162 = arith.constant 0 : index
    %215 = vector.load %arg12[%c24_161, %c0_162] : memref<32x32xf32, #tpu.memory_space<vmem>>, vector<8x32xf32>
    %cst_163 = arith.constant dense<0.000000e+00> : vector<8x32xf32>
    %216 = tpu.matmul %214, %215, %cst_163 {dimension_numbers = #tpu.dot_dimension_numbers<[1], [0], [0], [1], [0, 0, 1, 1], [], []>} : vector<8x8xf32>, vector<8x32xf32>, vector<8x32xf32> -> vector<8x32xf32>
    %217 = arith.addf %194, %216 : vector<8x32xf32>
    %c0_164 = arith.constant 0 : index
    %c0_165 = arith.constant 0 : index
    %218 = vector.load %arg13[%c0_164, %c0_165] : memref<1x32xf32, #tpu.memory_space<vmem>>, vector<1x32xf32>
    %c0_166 = arith.constant 0 : index
    %c0_167 = arith.constant 0 : index
    %219 = vector.load %arg14[%c0_166, %c0_167] : memref<1x32xf32, #tpu.memory_space<vmem>>, vector<1x32xf32>
    %cst_168 = arith.constant dense<0.000000e+00> : vector<8xf32>
    %220 = vector.multi_reduction <add>, %217, %cst_168 [1] : vector<8x32xf32> to vector<8xf32>
    %221 = vector.shape_cast %220 : vector<8xf32> to vector<8x1xf32>
    %cst_169 = arith.constant 3.200000e+01 : f32
    %222 = vector.broadcast %cst_169 : f32 to vector<8x1xf32>
    %223 = arith.divf %221, %222 : vector<8x1xf32>
    %224 = vector.broadcast %223 : vector<8x1xf32> to vector<8x32xf32>
    %225 = arith.subf %217, %224 : vector<8x32xf32>
    %226 = arith.mulf %225, %225 : vector<8x32xf32>
    %cst_170 = arith.constant dense<0.000000e+00> : vector<8xf32>
    %227 = vector.multi_reduction <add>, %226, %cst_170 [1] : vector<8x32xf32> to vector<8xf32>
    %228 = vector.shape_cast %227 : vector<8xf32> to vector<8x1xf32>
    %cst_171 = arith.constant 3.200000e+01 : f32
    %229 = vector.broadcast %cst_171 : f32 to vector<8x1xf32>
    %230 = arith.divf %228, %229 : vector<8x1xf32>
    %231 = vector.broadcast %223 : vector<8x1xf32> to vector<8x32xf32>
    %232 = arith.subf %217, %231 : vector<8x32xf32>
    %cst_172 = arith.constant 9.99999997E-7 : f32
    %233 = vector.broadcast %cst_172 : f32 to vector<8x1xf32>
    %234 = arith.addf %230, %233 : vector<8x1xf32>
    %235 = math.rsqrt %234 : vector<8x1xf32>
    %236 = vector.broadcast %235 : vector<8x1xf32> to vector<8x32xf32>
    %237 = arith.mulf %232, %236 : vector<8x32xf32>
    %238 = vector.broadcast %218 : vector<1x32xf32> to vector<8x32xf32>
    %239 = arith.mulf %237, %238 : vector<8x32xf32>
    %240 = vector.broadcast %219 : vector<1x32xf32> to vector<8x32xf32>
    %241 = arith.addf %239, %240 : vector<8x32xf32>
    %c0_173 = arith.constant 0 : index
    %c0_174 = arith.constant 0 : index
    %242 = vector.load %arg15[%c0_173, %c0_174] : memref<32x64xf32, #tpu.memory_space<vmem>>, vector<32x64xf32>
    %cst_175 = arith.constant dense<0.000000e+00> : vector<8x64xf32>
    %243 = tpu.matmul %241, %242, %cst_175 {dimension_numbers = #tpu.dot_dimension_numbers<[1], [0], [0], [1], [0, 0, 1, 1], [], []>} : vector<8x32xf32>, vector<32x64xf32>, vector<8x64xf32> -> vector<8x64xf32>
    %c0_176 = arith.constant 0 : index
    %c0_177 = arith.constant 0 : index
    %244 = vector.load %arg16[%c0_176, %c0_177] : memref<1x64xf32, #tpu.memory_space<vmem>>, vector<1x64xf32>
    %245 = vector.broadcast %244 : vector<1x64xf32> to vector<8x64xf32>
    %246 = arith.addf %243, %245 : vector<8x64xf32>
    %cst_178 = arith.constant 0.000000e+00 : f32
    %247 = vector.broadcast %cst_178 : f32 to vector<8x64xf32>
    %248 = arith.maximumf %246, %247 : vector<8x64xf32>
    %c0_179 = arith.constant 0 : index
    %c0_180 = arith.constant 0 : index
    %249 = vector.load %arg17[%c0_179, %c0_180] : memref<64x32xf32, #tpu.memory_space<vmem>>, vector<64x32xf32>
    %cst_181 = arith.constant dense<0.000000e+00> : vector<8x32xf32>
    %250 = tpu.matmul %248, %249, %cst_181 {dimension_numbers = #tpu.dot_dimension_numbers<[1], [0], [0], [1], [0, 0, 1, 1], [], []>} : vector<8x64xf32>, vector<64x32xf32>, vector<8x32xf32> -> vector<8x32xf32>
    %c0_182 = arith.constant 0 : index
    %c0_183 = arith.constant 0 : index
    %251 = vector.load %arg18[%c0_182, %c0_183] : memref<1x32xf32, #tpu.memory_space<vmem>>, vector<1x32xf32>
    %252 = vector.broadcast %251 : vector<1x32xf32> to vector<8x32xf32>
    %253 = arith.addf %250, %252 : vector<8x32xf32>
    %254 = arith.addf %253, %241 : vector<8x32xf32>
    %c0_184 = arith.constant 0 : index
    %c0_185 = arith.constant 0 : index
    %255 = vector.load %arg19[%c0_184, %c0_185] : memref<1x32xf32, #tpu.memory_space<vmem>>, vector<1x32xf32>
    %c0_186 = arith.constant 0 : index
    %c0_187 = arith.constant 0 : index
    %256 = vector.load %arg20[%c0_186, %c0_187] : memref<1x32xf32, #tpu.memory_space<vmem>>, vector<1x32xf32>
    %cst_188 = arith.constant dense<0.000000e+00> : vector<8xf32>
    %257 = vector.multi_reduction <add>, %254, %cst_188 [1] : vector<8x32xf32> to vector<8xf32>
    %258 = vector.shape_cast %257 : vector<8xf32> to vector<8x1xf32>
    %cst_189 = arith.constant 3.200000e+01 : f32
    %259 = vector.broadcast %cst_189 : f32 to vector<8x1xf32>
    %260 = arith.divf %258, %259 : vector<8x1xf32>
    %261 = vector.broadcast %260 : vector<8x1xf32> to vector<8x32xf32>
    %262 = arith.subf %254, %261 : vector<8x32xf32>
    %263 = arith.mulf %262, %262 : vector<8x32xf32>
    %cst_190 = arith.constant dense<0.000000e+00> : vector<8xf32>
    %264 = vector.multi_reduction <add>, %263, %cst_190 [1] : vector<8x32xf32> to vector<8xf32>
    %265 = vector.shape_cast %264 : vector<8xf32> to vector<8x1xf32>
    %cst_191 = arith.constant 3.200000e+01 : f32
    %266 = vector.broadcast %cst_191 : f32 to vector<8x1xf32>
    %267 = arith.divf %265, %266 : vector<8x1xf32>
    %268 = vector.broadcast %260 : vector<8x1xf32> to vector<8x32xf32>
    %269 = arith.subf %254, %268 : vector<8x32xf32>
    %cst_192 = arith.constant 9.99999997E-7 : f32
    %270 = vector.broadcast %cst_192 : f32 to vector<8x1xf32>
    %271 = arith.addf %267, %270 : vector<8x1xf32>
    %272 = math.rsqrt %271 : vector<8x1xf32>
    %273 = vector.broadcast %272 : vector<8x1xf32> to vector<8x32xf32>
    %274 = arith.mulf %269, %273 : vector<8x32xf32>
    %275 = vector.broadcast %255 : vector<1x32xf32> to vector<8x32xf32>
    %276 = arith.mulf %274, %275 : vector<8x32xf32>
    %277 = vector.broadcast %256 : vector<1x32xf32> to vector<8x32xf32>
    %278 = arith.addf %276, %277 : vector<8x32xf32>
    %c0_193 = arith.constant 0 : index
    %c0_194 = arith.constant 0 : index
    %c0_195 = arith.constant 0 : index
    %279 = vector.load %arg21[%c0_193, %c0_194, %c0_195] : memref<1x8x32xf32, #tpu.memory_space<vmem>>, vector<1x8x32xf32>
    %280 = vector.shape_cast %279 : vector<1x8x32xf32> to vector<8x32xf32>
    %281 = vector.shape_cast %278 : vector<8x32xf32> to vector<1x8x32xf32>
    tpu.vector_store %arg21[%c0_193, %c0_194, %c0_195], %281 {strides = array<i32>} : memref<1x8x32xf32, #tpu.memory_space<vmem>>, vector<1x8x32xf32>,
    return
  }
  func.func @transform_0(%arg0: i32, %arg1: i32) -> (i32, i32, i32) {
    %c0_i32 = arith.constant 0 : i32
    %c0_i32_0 = arith.constant 0 : i32
    return %arg0, %arg1, %c0_i32 : i32, i32, i32
  }
  func.func @transform_1(%arg0: i32, %arg1: i32) -> (i32, i32, i32, i32) {
    %c0_i32 = arith.constant 0 : i32
    %c0_i32_0 = arith.constant 0 : i32
    %c0_i32_1 = arith.constant 0 : i32
    %c0_i32_2 = arith.constant 0 : i32
    return %arg0, %c0_i32, %c0_i32_0, %c0_i32_1 : i32, i32, i32, i32
  }
  func.func @transform_2(%arg0: i32, %arg1: i32) -> (i32, i32, i32, i32) {
    %c0_i32 = arith.constant 0 : i32
    %c0_i32_0 = arith.constant 0 : i32
    %c0_i32_1 = arith.constant 0 : i32
    %c0_i32_2 = arith.constant 0 : i32
    return %arg0, %c0_i32, %c0_i32_0, %c0_i32_1 : i32, i32, i32, i32
  }
  func.func @transform_3(%arg0: i32, %arg1: i32) -> (i32, i32, i32, i32) {
    %c0_i32 = arith.constant 0 : i32
    %c0_i32_0 = arith.constant 0 : i32
    %c0_i32_1 = arith.constant 0 : i32
    %c0_i32_2 = arith.constant 0 : i32
    return %arg0, %c0_i32, %c0_i32_0, %c0_i32_1 : i32, i32, i32, i32
  }
  func.func @transform_4(%arg0: i32, %arg1: i32) -> (i32, i32, i32, i32) {
    %c0_i32 = arith.constant 0 : i32
    %c0_i32_0 = arith.constant 0 : i32
    %c0_i32_1 = arith.constant 0 : i32
    %c0_i32_2 = arith.constant 0 : i32
    return %arg0, %c0_i32, %c0_i32_0, %c0_i32_1 : i32, i32, i32, i32
  }
  func.func @transform_5(%arg0: i32, %arg1: i32) -> (i32, i32) {
    %c0_i32 = arith.constant 0 : i32
    %c0_i32_0 = arith.constant 0 : i32
    %c0_i32_1 = arith.constant 0 : i32
    return %c0_i32, %c0_i32_0 : i32, i32
  }
  func.func @transform_6(%arg0: i32, %arg1: i32) -> (i32, i32) {
    %c0_i32 = arith.constant 0 : i32
    %c0_i32_0 = arith.constant 0 : i32
    %c0_i32_1 = arith.constant 0 : i32
    return %c0_i32, %c0_i32_0 : i32, i32
  }
  func.func @transform_7(%arg0: i32, %arg1: i32) -> (i32, i32) {
    %c0_i32 = arith.constant 0 : i32
    %c0_i32_0 = arith.constant 0 : i32
    %c0_i32_1 = arith.constant 0 : i32
    return %c0_i32, %c0_i32_0 : i32, i32
  }
  func.func @transform_8(%arg0: i32, %arg1: i32) -> (i32, i32) {
    %c0_i32 = arith.constant 0 : i32
    %c0_i32_0 = arith.constant 0 : i32
    %c0_i32_1 = arith.constant 0 : i32
    return %c0_i32, %c0_i32_0 : i32, i32
  }
  func.func @transform_9(%arg0: i32, %arg1: i32) -> (i32, i32) {
    %c0_i32 = arith.constant 0 : i32
    %c0_i32_0 = arith.constant 0 : i32
    %c0_i32_1 = arith.constant 0 : i32
    return %c0_i32, %c0_i32_0 : i32, i32
  }
  func.func @transform_10(%arg0: i32, %arg1: i32) -> (i32, i32) {
    %c0_i32 = arith.constant 0 : i32
    %c0_i32_0 = arith.constant 0 : i32
    %c0_i32_1 = arith.constant 0 : i32
    return %c0_i32, %c0_i32_0 : i32, i32
  }
  func.func @transform_11(%arg0: i32, %arg1: i32) -> (i32, i32) {
    %c0_i32 = arith.constant 0 : i32
    %c0_i32_0 = arith.constant 0 : i32
    %c0_i32_1 = arith.constant 0 : i32
    return %c0_i32, %c0_i32_0 : i32, i32
  }
  func.func @transform_12(%arg0: i32, %arg1: i32) -> (i32, i32) {
    %c0_i32 = arith.constant 0 : i32
    %c0_i32_0 = arith.constant 0 : i32
    %c0_i32_1 = arith.constant 0 : i32
    return %c0_i32, %c0_i32_0 : i32, i32
  }
  func.func @transform_13(%arg0: i32, %arg1: i32) -> (i32, i32) {
    %c0_i32 = arith.constant 0 : i32
    %c0_i32_0 = arith.constant 0 : i32
    %c0_i32_1 = arith.constant 0 : i32
    return %c0_i32, %c0_i32_0 : i32, i32
  }
  func.func @transform_14(%arg0: i32, %arg1: i32) -> (i32, i32) {
    %c0_i32 = arith.constant 0 : i32
    %c0_i32_0 = arith.constant 0 : i32
    %c0_i32_1 = arith.constant 0 : i32
    return %c0_i32, %c0_i32_0 : i32, i32
  }
  func.func @transform_15(%arg0: i32, %arg1: i32) -> (i32, i32) {
    %c0_i32 = arith.constant 0 : i32
    %c0_i32_0 = arith.constant 0 : i32
    %c0_i32_1 = arith.constant 0 : i32
    return %c0_i32, %c0_i32_0 : i32, i32
  }
  func.func @transform_16(%arg0: i32, %arg1: i32) -> (i32, i32) {
    %c0_i32 = arith.constant 0 : i32
    %c0_i32_0 = arith.constant 0 : i32
    %c0_i32_1 = arith.constant 0 : i32
    return %c0_i32, %c0_i32_0 : i32, i32
  }
  func.func @transform_17(%arg0: i32, %arg1: i32) -> (i32, i32) {
    %c0_i32 = arith.constant 0 : i32
    %c0_i32_0 = arith.constant 0 : i32
    %c0_i32_1 = arith.constant 0 : i32
    return %c0_i32, %c0_i32_0 : i32, i32
  }
  func.func @transform_18(%arg0: i32, %arg1: i32) -> (i32, i32) {
    %c0_i32 = arith.constant 0 : i32
    %c0_i32_0 = arith.constant 0 : i32
    %c0_i32_1 = arith.constant 0 : i32
    return %c0_i32, %c0_i32_0 : i32, i32
  }
  func.func @transform_19(%arg0: i32, %arg1: i32) -> (i32, i32, i32) {
    %c0_i32 = arith.constant 0 : i32
    %c0_i32_0 = arith.constant 0 : i32
    return %arg0, %arg1, %c0_i32 : i32, i32, i32
  }
  func.func @transform_20(%arg0: i32, %arg1: i32) -> (i32, i32, i32, i32) {
    %c0_i32 = arith.constant 0 : i32
    %c0_i32_0 = arith.constant 0 : i32
    %c0_i32_1 = arith.constant 0 : i32
    return %arg0, %c0_i32, %arg1, %c0_i32_0 : i32, i32, i32, i32
  }
  func.func @transform_21(%arg0: i32, %arg1: i32) -> (i32, i32, i32, i32) {
    %c0_i32 = arith.constant 0 : i32
    %c0_i32_0 = arith.constant 0 : i32
    %c0_i32_1 = arith.constant 0 : i32
    return %arg0, %c0_i32, %arg1, %c0_i32_0 : i32, i32, i32, i32
  }
}

</mosaic_0001>

<bundles_post_ra>
// kernel: tpu_custom_call.1
= control target key start
LH: loop header
LB: loop body
LE: loop exit
PB: predicated region body
PF: predicated region fallthrough
CT: control target
= control target key end

     0   :  { %s3649_s0 = inlined_call_operand.vmem [shape: f32[2,16,32], index: 0, kind: input, shape index: {}]   ;;  %s3650_s1 = inlined_call_operand.vmem [shape: f32[2,4,8,16], index: 1, kind: input, shape index: {}]   ;;  %s3651_s2 = inlined_call_operand.hbm [shape: f32[2,4,8,16], index: 2, kind: input, shape index: {}]   ;;  %s3652_s3 = inlined_call_operand.hbm [shape: f32[2,4,8,16], index: 3, kind: input, shape index: {}]   ;;  %s3653_s4 = inlined_call_operand.hbm [shape: f32[2,4,8,16], index: 4, kind: input, shape index: {}]   ;;  %s3654_s5 = inlined_call_operand.hbm [shape: f32[32,32], index: 5, kind: input, shape index: {}]   ;;  %s3655_s6 = inlined_call_operand.hbm [shape: f32[32,32], index: 6, kind: input, shape index: {}]   ;;  %s3656_s7 = inlined_call_operand.vmem [shape: f32[1,32], index: 7, kind: input, shape index: {}]   ;;  %s3657_s8 = inlined_call_operand.vmem [shape: f32[1,32], index: 8, kind: input, shape index: {}]   ;;  %s3658_s9 = inlined_call_operand.hbm [shape: f32[32,32], index: 9, kind: input, shape index: {}]   ;;  %s3659_s10 = inlined_call_operand.hbm [shape: f32[32,32], index: 10, kind: input, shape index: {}]   ;;  %s3660_s11 = inlined_call_operand.vmem [shape: f32[1,32], index: 11, kind: input, shape index: {}]   ;;  %s3661_s12 = inlined_call_operand.vmem [shape: f32[1,32], index: 12, kind: input, shape index: {}]   ;;  %s3662_s13 = inlined_call_operand.hbm [shape: f32[32,64], index: 13, kind: input, shape index: {}]   ;;  %s3663_s14 = inlined_call_operand.vmem [shape: f32[1,64], index: 14, kind: input, shape index: {}]   ;;  %s3664_s15 = inlined_call_operand.vmem [shape: f32[64,32], index: 15, kind: input, shape index: {}]   ;;  %s3665_s16 = inlined_call_operand.vmem [shape: f32[1,32], index: 16, kind: input, shape index: {}]   ;;  %s3666_s17 = inlined_call_operand.vmem [shape: f32[1,32], index: 17, kind: input, shape index: {}]   ;;  %s3667_s18 = inlined_call_operand.vmem [shape: f32[1,32], index: 18, kind: input, shape index: {}]   ;;  %s3668_s19 = inlined_call_operand.hbm [shape: f32[2,16,32], index: 19, kind: output, shape index: {0}]   ;;  %s3669_s20 = inlined_call_operand.hbm [shape: f32[2,4,16,16], index: 20, kind: output, shape index: {1}]   ;;  %s3670_s21 = inlined_call_operand.hbm [shape: f32[2,4,16,16], index: 21, kind: output, shape index: {2}]  }
   0x1   :  { %3692 = sst [smem:[#allocation38_spill]] %s3649_s0 }
   0x2   :  { %3693 = sst [smem:[#allocation39_spill]] %s3650_s1 }
   0x3   :  { %3694 = sst [smem:[#allocation40_spill]] %s3651_s2 }
   0x4   :  { %3695 = sst [smem:[#allocation41_spill]] %s3652_s3 }
   0x5   :  { %3696 = sst [smem:[#allocation42_spill]] %s3653_s4 }
   0x6   :  { %3697 = sst [smem:[#allocation43_spill]] %s3654_s5 }
   0x7   :  { %3698 = sst [smem:[#allocation44_spill]] %s3655_s6 }
   0x8   :  { %3699 = sst [smem:[#allocation45_spill]] %s3658_s9 }
   0x9   :  { %3700 = sst [smem:[#allocation46_spill]] %s3659_s10 }
   0xa   :  { %3701 = sst [smem:[#allocation47_spill]] %s3660_s11 }
   0xb   :  { %3702 = sst [smem:[#allocation48_spill]] %s3661_s12 }
   0xc   :  { %3703 = sst [smem:[#allocation49_spill]] %s3662_s13 }
   0xd   :  { %3704 = sst [smem:[#allocation50_spill]] %s3663_s14 }
   0xe   :  { %3705 = sst [smem:[#allocation51_spill]] %s3664_s15 }
   0xf   :  { %3706 = sst [smem:[#allocation52_spill]] %s3665_s16 }
  0x10   :  { %3707 = sst [smem:[#allocation53_spill]] %s3666_s17 }
  0x11   :  { %3708 = sst [smem:[#allocation54_spill]] %s3667_s18 }
  0x12   :  { %3709 = sst [smem:[#allocation55_spill]] %s3668_s19 }
  0x13   :  { %3710 = sst [smem:[#allocation56_spill]] %s3669_s20 }
  0x14   :  { %3711 = sst [smem:[#allocation57_spill]] %s3670_s21 }
  0x15   :  { %27 = vsyncpa [#allocation3], 0 }
  0x16   :  { %29 = vsyncpa [#allocation3 + $0x1], 0 }
  0x17   :  { %30 = vsyncpa [#allocation6], 0 }
  0x18   :  { %32 = vsyncpa [#allocation6 + $0x1], 0 }
  0x19   :  { %33 = vsyncpa [#allocation9], 0 }
  0x1a   :  { %34 = vsyncpa [#allocation12], 0 }
  0x1b   :  { %35 = vsyncpa [#allocation15], 0 }
  0x1c   :  { %36 = vsyncpa [#allocation4], 0 }
  0x1d   :  { %38 = vsyncpa [#allocation4 + $0x1], 0 }
  0x1e   :  { %39 = vsyncpa [#allocation18], 0 }
  0x1f   :  { %41 = vsyncpa [#allocation18 + $0x1], 0  ;;  %s3121_s2 = smov 0   ;;  %s3123_s25 = smov 0  }
  0x20   :  { %s3125_s26 = smov 0   ;;  %s3127_s27 = smov 0  }
  0x21   :  { %s3129_s3 = smov 0   ;;  %s3131_s28 = smov 0  }
  0x22   :  { %s3133_s29 = smov 0   ;;  %s3135_s0 = smov 0  }
  0x23   :  { %s3137_s4 = smov 0   ;;  %s3139_s30 = smov 0  }
  0x24   :  { %s3141_s5 = smov 0  }
  0x25 LB: > { %3712 = sst [smem:[#allocation27_spill]] %s2955_s2  ;;  %s3177_s22 = sadd.s32 4294967295, %s2995_s5   ;;  %s2995_s5 = sphi %s3141_s5, %s47_s5   ;;  %s2991_s30 = sphi %s3139_s30, %s3774_s30   ;;  %s2987_s4 = sphi %s3137_s4, %s3766_s4   ;;  %s2983_s0 = sphi %s3135_s0, %s3773_s0   ;;  %s2979_s29 = sphi %s3133_s29, %s3764_s29   ;;  %s2975_s28 = sphi %s3131_s28, %s3772_s28   ;;  %s2971_s3 = sphi %s3129_s3, %s3771_s3   ;;  %s2967_s27 = sphi %s3127_s27, %s3770_s27   ;;  %s2963_s26 = sphi %s3125_s26, %s3762_s26   ;;  %s2959_s25 = sphi %s3123_s25, %s3769_s25   ;;  %s2955_s2 = sphi %s3121_s2, %s3768_s2  }
  0x26   : > { %3713 = sst [smem:[#allocation28_spill]] %s2963_s26  ;;  %s3674_s23 = sadd.s32 4294967294, %s2995_s5  }
  0x27   : > { %3714 = sst [smem:[#allocation29_spill]] %s2987_s4  ;;  %p134_p0 = scmp.eq.s32.totalorder %s3177_s22, 0 }
  0x28   : > { %3715 = sst [smem:[#allocation30_spill]] %s2991_s30  ;;  %p504_p1 = scmp.ne.s32.totalorder %s2963_s26, %s2959_s25 }
  0x29   : > { %3716 = sst [smem:[#allocation31_spill]] %s2995_s5  ;;  %p505_p2 = scmp.eq.s32.totalorder %s3177_s22, 3 }
  0x2a   : > { %p510_p3 = scmp.ne.s32.totalorder %s2959_s25, %s2955_s2  ;;  %p511_p4 = scmp.eq.s32.totalorder %s3674_s23, 3 }
  0x2b   : > { %p2226_p5 = scmp.ge.s32.totalorder %s2995_s5, 1  ;;  %p3189_p6 = por %p505_p2, %p504_p1 }
  0x2c   : > { %p574_p7 = scmp.lt.s32.totalorder %s2995_s5, 5  ;;  %p3194_p8 = por %p511_p4, %p510_p3 }
  0x2d   : > { %s3717_s1 = scalar_select %p3189_p6, 1, 0 }
  0x2e   : > { %s3719_s24 = scalar_select %p3194_p8, 1, 0 }
  0x2f   : > { %3718 = sst [smem:[#allocation32_spill]] %s3717_s1  ;;  %p3198_p9 = pnand %p2226_p5, %p574_p7 }
  0x30   : > { %3720 = sst [smem:[#allocation33_spill]] %s3719_s24  ;;  %s2997_s23 = smov [#allocation8]  }
  0x31   : > { %s3722_s21 = sld [smem:[#allocation43_spill]]  ;;  %p2359_p10 = pneg %p3198_p9 }
  0x32   : > { %s587_s20 = sshll.u32 %s2997_s23, 4  ;;  %s3724_s9 = sld [smem:[#allocation45_spill]]  ;;  %s588_s20 = int_to_ptr.vmem [resolvable:$true] %s587_s20 }
  0x33   : > { %p3209_p11 = pnand %p2359_p10, %p134_p0  ;;  %s3681_s23 = smov 8  }
  0x34   : > { %s3000_s16 = smov [#allocation11]   ;;  %s56_s1 = sadd.s32 1, %s2987_s4 }
  0x35   : > { %s621_s14 = sshll.u32 %s3000_s16, 4  ;;  %p57_p12 = scmp.ge.s32.totalorder %s56_s1, 2  ;;  %s622_s14 = int_to_ptr.vmem [resolvable:$true] %s621_s14 }
  0x36   : > { %s59_s17 = sadd.s32 1, %s2991_s30  ;;  %p127_p13 = scmp.ne.s32.totalorder %s2975_s28, %s2971_s3 }
  0x37   : > { %s585_s2 = sshll.u32 %s3722_s21, 4  ;;  %s3679_s21 = smov 128   ;;  %s586_s2 = int_to_ptr.hbm [resolvable:$true] %s585_s2 }
  0x38   : > { %s619_s19 = sshll.u32 %s3724_s9, 4  ;;  %s120_s9 = sadd.s32 1, %s2975_s28  ;;  %s620_s19 = int_to_ptr.hbm [resolvable:$true] %s619_s19 }
  0x39   : > { %2362 = dma.hbm_to_vmem [thread:$0]  (!%p3209_p11), %s586_s2, 512, %s588_s20, [#allocation9], %s3679_s21, %s3679_s21, %s3681_s23  }
  0x3a   : > { %2368 = dma.hbm_to_vmem [thread:$0]  (!%p3209_p11), %s620_s19, 512, %s622_s14, [#allocation12], %s3679_s21, %s3679_s21, %s3681_s23  }
  0x3b   : > { %s3776_s1 = smov (%p57_p12, %s56_s1), 0  ;;  %s3778_s17 = smov (!%p57_p12, %s59_s17), %s2991_s30 }
  0x3c   : > { %3725 = sst [smem:[#allocation34_spill]] %s3776_s1  ;;  %p128_p1 = scmp.eq.s32.totalorder %s2995_s5, 0 }
  0x3d   : > { %p133_p2 = scmp.ne.s32.totalorder %s2971_s3, %s2967_s27  ;;  %p61_p3 = scmp.ge.s32.totalorder %s3778_s17, 2 }
  0x3e   : > { %s490_s14 = ssub.s32 %s2987_s4, %s3776_s1  ;;  %p3239_p4 = por %p128_p1, %p127_p13 }
  0x3f   : > { %p3245_p5 = por %p134_p0, %p133_p2  ;;  %s3780_s17 = smov (%p61_p3, %s3778_s17), 0 }
  0x40   : > { %3728 = sst [smem:[#allocation35_spill]] %s3780_s17  ;;  %s494_s2 = sadd.s32 1, %s2963_s26 }
  0x41   : > { %p2400_p7 = scmp.lt.s32.totalorder %s2995_s5, 4  ;;  %s117_s27 = ssub.s32 %s2991_s30, %s3780_s17 }
  0x42   : > { %s3686_s19 = sand.u32 1, %s2975_s28   ;;  %p118_p10 = scmp.eq.s32.totalorder %s117_s27, 0 }
  0x43   : > { %s491_s21 = sor.u32 %s490_s14, %s117_s27  ;;  %s3258_s23 = sshll.u32 %s3686_s19, 5 }
  0x44   : > { %p492_p12 = scmp.eq.s32.totalorder %s491_s21, 0  ;;  %s3267_s12 = sshll.u32 %s2991_s30, 5 }
  0x45   : > { %s3261_s1 = scalar_select %p118_p10, %s2975_s28, %s120_s9  }
  0x46   : > { %s3264_s4 = scalar_select %p492_p12, %s2963_s26, %s494_s2  }
  0x47   : > { %3729 = sst [smem:[#allocation36_spill]] %s3261_s1  ;;  %p3271_p13 = pnand %p2400_p7, %p3239_p4 }
  0x48   : > { %3730 = sst [smem:[#allocation37_spill]] %s3264_s4  ;;  %s725_s17 = sand.u32 1, %s2995_s5  }
  0x49   : > { %s3732_s27 = sld [smem:[#allocation41_spill]]  ;;  %s729_s15 = scalar_lea.vmem [#allocation5], %s3258_s23 }
  0x4a   : > { %s737_s9 = sshll.u32 %s729_s15, 4  ;;  %s3733_s6 = sld [smem:[#allocation44_spill]]  ;;  %s738_s9 = int_to_ptr.vmem [resolvable:$true] %s737_s9 }
  0x4b   : > { %s3284_s4 = scalar_lea.sflag [#allocation6], %s725_s17  ;;  %s3734_s26 = smov 8  }
  0x4c   : > { %s3735_s5 = smov 128   ;;  %s3001_s14 = smov [#allocation10]  }
  0x4d   : > { %s601_s15 = sshll.u32 %s3001_s14, 4  ;;  %s3736_s10 = sld [smem:[#allocation46_spill]]  ;;  %s602_s15 = int_to_ptr.vmem [resolvable:$true] %s601_s15 }
  0x4e   : > { %s3737_s13 = sld [smem:[#allocation49_spill]]  ;;  %s3003_s14 = smov [#allocation14]  }
  0x4f   : > { %s734_s19 = scalar_lea.hbm %s3732_s27, %s3267_s12  ;;  %s3738_s21 = sld [smem:[#allocation40_spill]] }
  0x50   : > { %s735_s1 = sshll.u32 %s734_s19, 4  ;;  %s599_s16 = sshll.u32 %s3733_s6, 4  ;;  %s736_s1 = int_to_ptr.hbm [resolvable:$true] %s735_s1  ;;  %s600_s16 = int_to_ptr.hbm [resolvable:$true] %s599_s16 }
  0x51   : > { %2381 = dma.hbm_to_vmem [thread:$0]  (!%p3271_p13), %s736_s1, 512, %s738_s9, %s3284_s4, %s3735_s5, %s3735_s5, %s3734_s26  }
  0x52   : > { %2365 = dma.hbm_to_vmem [thread:$0]  (!%p3209_p11), %s600_s16, 512, %s602_s15, [#allocation9], %s3735_s5, %s3735_s5, %s3734_s26  }
  0x53   : > { %s633_s30 = sshll.u32 %s3736_s10, 4  ;;  %s3002_s9 = smov [#allocation13]   ;;  %s634_s30 = int_to_ptr.hbm [resolvable:$true] %s633_s30 }
  0x54   : > { %s653_s1 = sshll.u32 %s3737_s13, 4  ;;  %s635_s2 = sshll.u32 %s3002_s9, 4  ;;  %s654_s1 = int_to_ptr.hbm [resolvable:$true] %s653_s1  ;;  %s636_s2 = int_to_ptr.vmem [resolvable:$true] %s635_s2 }
  0x55   : > { %2371 = dma.hbm_to_vmem [thread:$0]  (!%p3209_p11), %s634_s30, 512, %s636_s2, [#allocation12], %s3735_s5, %s3735_s5, %s3734_s26  }
  0x56   : > { %s655_s19 = sshll.u32 %s3003_s14, 4  ;;  %s712_s17 = scalar_lea.hbm %s3738_s21, %s3267_s12  ;;  %s656_s19 = int_to_ptr.vmem [resolvable:$true] %s655_s19 }
  0x57   : > { %2374 = dma.hbm_to_vmem [thread:$0]  (!%p3209_p11), %s654_s1, 512, %s656_s19, [#allocation15], %s3735_s5, %s3735_s5, %s3734_s26  }
  0x58   : > { %s707_s27 = scalar_lea.vmem [#allocation2], %s3258_s23  ;;  %s713_s6 = sshll.u32 %s712_s17, 4  ;;  %s714_s6 = int_to_ptr.hbm [resolvable:$true] %s713_s6 }
  0x59   : > { %s715_s9 = sshll.u32 %s707_s27, 4  ;;  %s3739_s30 = sand.u32 1, %s2975_s28   ;;  %s716_s9 = int_to_ptr.vmem [resolvable:$true] %s715_s9 }
  0x5a   : > { %s704_s2 = scalar_lea.sflag [#allocation3], %s3739_s30  ;;  %s3740_s10 = sld [smem:[#allocation42_spill]] }
  0x5b   : > { %2378 = dma.hbm_to_vmem [thread:$0]  (!%p3271_p13), %s714_s6, 512, %s716_s9, %s704_s2, %s3735_s5, %s3735_s5, %s3734_s26  }
  0x5c   : > { %s751_s19 = scalar_lea.vmem [#allocation7], %s3258_s23  ;;  %s773_s6 = sand.u32 (!%p3198_p9), 1, %s2971_s3  }
  0x5d   : > { %s759_s13 = sshll.u32 %s751_s19, 4  ;;  %s2243_s15 = sshll.u32 (!%p3198_p9), %s773_s6, 5  ;;  %s760_s13 = int_to_ptr.vmem [resolvable:$true] %s759_s13 }
  0x5e   : > { %771 = sbr.rel (%p3198_p9) target bundleno = 4034 (0xfc2), region = 96  ;;  %s774_s21 = scalar_lea.sflag (!%p3198_p9), [#allocation3], %s773_s6 }
  0x5f   : > { %s3339_s17 = scalar_lea.vmem (!%p3198_p9), [#allocation2], %s2243_s15 }
  0x60   : > { %s756_s1 = scalar_lea.hbm %s3740_s10, %s3267_s12 }
  0x61   : > { %s757_s16 = sshll.u32 %s756_s1, 4  ;;  %s758_s16 = int_to_ptr.hbm [resolvable:$true] %s757_s16 }
  0x62   : > { %2384 = dma.hbm_to_vmem [thread:$0]  (!%p3271_p13), %s758_s16, 512, %s760_s13, %s3284_s4, %s3735_s5, %s3735_s5, %s3734_s26  }
  0x63   : > { %2926 = dma.done.wait (%p3245_p5), %s774_s21, 512  }
  0x64   : > { %2928 = vsyncadd (%p3245_p5), %s774_s21, 4294966784  ;;  %s783_s10 = sand.u32 1, %s3177_s22   ;;  %s3348_s12 = scalar_lea.vmem [#allocation5], %s2243_s15 }
  0x65   : > { %s784_s11 = scalar_lea.sflag [#allocation6], %s783_s10 }
  0x66   : > { %2930 = dma.done.wait (%p3245_p5), %s784_s11, 1024  }
  0x67   : > { %2932 = vsyncadd (%p3245_p5), %s784_s11, 4294966272  ;;  %s3354_s13 = scalar_lea.vmem [#allocation7], %s2243_s15 }
  0x68   : > { %2934 = dma.done.wait (%p134_p0), [#allocation9], 1024  }
  0x69   : > { %2936 = vsyncadd (%p134_p0), [#allocation9], 4294966272 }
  0x6a   : > { %2938 = dma.done.wait (%p134_p0), [#allocation12], 1024  }
  0x6b   : > { %2940 = vsyncadd (%p134_p0), [#allocation12], 4294966272 }
  0x6c   : > { %2942 = dma.done.wait (%p134_p0), [#allocation15], 512  }
  0x6d   : > { %2944 = vsyncadd (%p134_p0), [#allocation15], 4294966784  ;;  %p915_p9 = scmp.lt.s32.totalorder %s2983_s0, 1  ;;  %p917_p11 = scmp.lt.s32.totalorder %s2979_s29, 1  ;;  %v932_v0 = vld [vmem:[#allocation8 + $0x18] sm:$0xff]  ;;  %v931_v1 = vld [vmem:[#allocation8 + $0x10] sm:$0xff] }
  0x6e   : > { %949 = vmatpush.msra.mxu0 %v932_v0  ;;  %v930_v2 = vld [vmem:[#allocation8 + $0x8] sm:$0xff]  ;;  %s3741_s9 = sld [smem:[#allocation38_spill]]  ;;  %v929_v3 = vld [vmem:[#allocation8] sm:$0xff]  ;;  %vm933_vm0 = vcmask 261120   ;;  %vm960_vm1 = vcmask 64512   ;;  %s3004_s16 = smov 120  }
  0x6f   : > { %s916_s18 = scalar_select %p915_p9, %s2983_s0, 1  ;;  %vm984_vm2 = vcmask 130048   ;;  %v959_v19 = vld [vmem:[%s3339_s17] sm:$0xff]  ;;  %v2264_v29 = vld [vmem:[%s3339_s17 + $0x8] sm:$0xff]  ;;  %v2271_v53 = vld [vmem:[%s3339_s17 + $0x10] sm:$0xff]  ;;  %vm1831_vm10 = vcmask 523264  }
  0x70   : > { %s918_s26 = scalar_select %p917_p11, %s2979_s29, 1  ;;  %950 = vmatpush.msra.mxu0 %v931_v1  ;;  %2260 = vmatpush.xpose.msk.msra.mxu2 %vm984_vm2, %v959_v19  ;;  %v1023_v28 = vld [vmem:[#allocation10] sm:$0xff]  ;;  %v1115_v36 = vld [vmem:[#allocation10 + $0x8] sm:$0xff]  ;;  %v1207_v62 = vld [vmem:[#allocation10 + $0x10] sm:$0xff] }
  0x71   : > { %s2254_s4 = sshll.u32 %s916_s18, 1  ;;  %s2326_s2 = sshll.u32 %s916_s18, 5  ;;  %1042 = vmatpush.msra.mxu3 %v1023_v28  ;;  %v2278_v63 = vld [vmem:[%s3339_s17 + $0x18] sm:$0xff] }
  0x72   : > { %s920_s5 = sadd.s32 %s2254_s4, %s918_s26  ;;  %951 = vmatpush.msra.mxu0 %v930_v2  ;;  %s3742_s1 = sld [smem:[#allocation39_spill]] }
  0x73   : > { %s2255_s23 = sshll.u32 %s920_s5, 3  ;;  %s3005_s6 = smov 104   ;;  %2267 = vmatpush.xpose.msk.msrb.mxu3 %vm984_vm2, %v2264_v29 }
  0x74   : > { %s922_s30 = scalar_lea.vmem %s3741_s9, %s2255_s23  ;;  %952 = vmatpush.msra.mxu0 %v929_v3  ;;  %s3396_s15 = sand.u32 1, %s2959_s25   ;;  %1134 = vmatpush.msrb.mxu2 %v1115_v36  ;;  %v2509_v36 = vld [vmem:[%s3656_s7] ss:$0 sm:$0xff] }
  0x75   : > { %v3375_v4 = vld [vmem:[%s922_s30] sm:$0xff]  ;;  %s2252_s21 = sshll.u32 %s3396_s15, 5  ;;  %s3006_s18 = smov 112  }
  0x76   : > { %2258 = vmatmul.msk.f32.vlgmr.msra.gmra.mxu0 %vm933_vm0, %v3375_v4  ;;  %s3401_s11 = scalar_lea.vmem [#allocation17], %s2252_s21  ;;  %s3467_s23 = scalar_lea.vmem [#allocation19], %s2252_s21 }
  0x77   : > { %2281 = vmatpush.xpose.msk.msrb.mxu0 %vm984_vm2, %v2278_v63  ;;  %s3743_s20 = sld [smem:[#allocation51_spill]]  ;;  %s3556_s9 = scalar_lea.sflag [#allocation18], %s783_s10 }
  0x78   : > { %s3382_s19 = scalar_lea.vmem %s3742_s1, %s2326_s2  ;;  %s3744_s21 = sld [smem:[#allocation47_spill]] }
  0x79   : > { %v958_v5 = vld [vmem:[%s3382_s19] sm:$0xff]  ;;  %v2263_v6 = vld [vmem:[%s3382_s19 + $0x8] sm:$0xff]  ;;  %v2270_v30 = vld [vmem:[%s3382_s19 + $0x10] sm:$0xff]  ;;  %s3745_s26 = sld [smem:[#allocation48_spill]] }
  0x7a   : > { %979 = vmatpush.msra.mxu1 %v958_v5  ;;  %v2277_v37 = vld [vmem:[%s3382_s19 + $0x18] sm:$0xff]  ;;  %s3746_s24 = sld [smem:[#allocation50_spill]] }
  0x7b   : > { %s3747_s19 = sld [smem:[#allocation52_spill]] }
  0x7c   : > { %1071 = vmatpush.msrb.mxu1 %v2263_v6  ;;  %s3749_s5 = sld [smem:[#allocation56_spill]] }
  0xf3   : > { %v954_v7 = vpop.f32.mrf.mxu0 }
  0xf4   : > { %v957_v8 = vmul.f32 0.35355338, %v954_v7 }
  0xf6   : > { %1052 = vrot.lane.b32.xlu0 %v957_v8, %s3004_s16  ;;  %2259 = vmatmul.msk.f32.vlgmr.msra.gmra.mxu1 %vm960_vm1, %v957_v8 }
  0xf7   : > { %1163 = vmatpush.msra.mxu1 %v2270_v30 }
 0x168   : > { %v1053_v9 = vpop.permute.xlu0 %1052 }
 0x169   : > { %2265 = vmatmul.msk.f32.vlgmr.msrb.gmra.mxu1 %vm960_vm1, %v1053_v9 }
 0x16a   : > { %2274 = vmatpush.xpose.msk.msrb.mxu1 %vm984_vm2, %v2271_v53 }
 0x173   : > { %v981_v10 = vpop.f32.mrf.mxu1 }
 0x174   : > { %v985_v11 = vsel %vm984_vm2, %v981_v10, -inf }
 0x175   : > { %986 = vmax.xlane.f32.xlu0 %v985_v11  ;;  %v3007_v11 = vmov 32.0  }
 0x1e6   : > { %v1073_v17 = vpop.f32.mrf.mxu1 }
 0x1e7   : > { %v1076_v18 = vsel %vm984_vm2, %v1073_v17, -inf }
 0x1e8   : > { %v987_v12 = vpop.xlane.xlu0 %986 }
 0x1e9   : > { %v988_v13 = vsub.f32 %v981_v10, %v987_v12 }
 0x1eb   : > { %v989_v14 = vmul.f32 1.442695, %v988_v13 }
 0x1ed   : > { %2517 = vpow2.f32 %v989_v14 }
 0x1f3   : > { %v2518_v15 = vpop.eup %2517 }
 0x1f4   : > { %v991_v16 = vsel %vm984_vm2, %v2518_v15, 0.0 }
 0x1f5   : > { %992 = vadd.xlane.f32.xlu1 %v991_v16 }
 0x1fd   : > { %1077 = vmax.xlane.f32.xlu1 %v1076_v18 }
 0x216   : > { %1236 = vrot.lane.b32.xlu1 %v957_v8, %s3005_s6 }
 0x268   : > { %v993_v20 = vpop.xlane.xlu1 %992 }
 0x269   : > { %2519 = vrcp.f32 %v993_v20 }
 0x26f   : > { %v2520_v21 = vpop.eup %2519 }
 0x270   : > { %v1078_v22 = vpop.xlane.xlu1 %1077  ;;  %v995_v23 = vmul.f32 %v2520_v21, %v2518_v15 }
 0x271   : > { %v1079_v24 = vsub.f32 %v1073_v17, %v1078_v22 }
 0x272   : > { %996 = vst.msk [vmem:[%s3401_s11] sm:$0xff] %vm984_vm2, %v995_v23  ;;  %2261 = vmatmul.msk.f32.vlgmr.msra.gmra.mxu2 %vm984_vm2, %v995_v23  ;;  %v1366_v23 = vld [vmem:[#allocation11 + $0x18] sm:$0xff] }
 0x273   : > { %v1080_v25 = vmul.f32 1.442695, %v1079_v24  ;;  %1255 = vmatpush.msra.mxu2 %v2277_v37  ;;  %v1365_v24 = vld [vmem:[#allocation11 + $0x10] sm:$0xff] }
 0x275   : > { %2521 = vpow2.f32 %v1080_v25  ;;  %v1364_v25 = vld [vmem:[#allocation11 + $0x8] sm:$0xff] }
 0x27b   : > { %v2522_v26 = vpop.eup %2521 }
 0x27c   : > { %v1082_v27 = vsel %vm984_vm2, %v2522_v26, 0.0 }
 0x27d   : > { %1083 = vadd.xlane.f32.xlu2 %v1082_v27 }
 0x288   : > { %v1237_v42 = vpop.permute.xlu1 %1236 }
 0x295   : > { %1144 = vrot.lane.b32.xlu2 %v957_v8, %s3006_s18 }
 0x2f0   : > { %v1084_v31 = vpop.xlane.xlu2 %1083 }
 0x2f1   : > { %2523 = vrcp.f32 %v1084_v31 }
 0x2f5   : > { %v1020_v32 = vpop.f32.mrf.mxu2 }
 0x2f6   : > { %2262 = vmatmul.msk.f32.vlgmr.msra.gmra.mxu3 %vm960_vm1, %v1020_v32 }
 0x2f7   : > { %v2524_v33 = vpop.eup %2523  ;;  %1226 = vmatpush.msra.mxu3 %v1207_v62 }
 0x2f8   : > { %v1145_v34 = vpop.permute.xlu2 %1144  ;;  %v1086_v35 = vmul.f32 %v2524_v33, %v2522_v26  ;;  %v1363_v26 = vld [vmem:[#allocation11] sm:$0xff] }
 0x2f9   : > { %2272 = vmatmul.msk.f32.vlgmr.msra.gmra.mxu1 %vm960_vm1, %v1145_v34 }
 0x2fa   : > { %2266 = vst.msk [vmem:[%s3401_s11 + $0x8] sm:$0xff] %vm984_vm2, %v1086_v35 }
 0x2fe   : > { %2268 = vmatmul.msk.f32.vlgmr.msrb.gmra.mxu3 %vm984_vm2, %v1086_v35 }
 0x2ff   : > { %1382 = vmatpush.msrb.mxu3 %v1366_v23 }
 0x301   : > { %1383 = vmatpush.msrb.mxu3 %v1365_v24 }
 0x303   : > { %1384 = vmatpush.msrb.mxu3 %v1364_v25 }
 0x305   : > { %1385 = vmatpush.msrb.mxu3 %v1363_v26 }
 0x376   : > { %v1165_v38 = vpop.f32.mrf.mxu1 }
 0x377   : > { %v1168_v39 = vsel %vm984_vm2, %v1165_v38, -inf }
 0x378   : > { %1169 = vmax.xlane.f32.xlu2 %v1168_v39  ;;  %v2510_v39 = vld [vmem:[%s3657_s8] ss:$0 sm:$0xff] }
 0x379   : > { %v1044_v40 = vpop.f32.mrf.mxu3 }
 0x37a   : > { %v1047_v48 = vadd.f32 %v1044_v40, %v3375_v4  ;;  %v1299_v4 = vld [vmem:[#allocation10 + $0x18] sm:$0xff] }
 0x37b   : > { %1318 = vmatpush.msra.mxu1 %v1299_v4  ;;  %v1546_v4 = vld [vmem:[#allocation13 + $0x8] sm:$0xff] }
 0x381   : > { %v1112_v41 = vpop.f32.mrf.mxu3 }
 0x382   : > { %2269 = vmatmul.msk.f32.vlgmr.msrb.gmra.mxu2 %vm960_vm1, %v1112_v41 }
 0x38a   : > { %2279 = vmatmul.msk.f32.vlgmr.msra.gmra.mxu2 %vm960_vm1, %v1237_v42  ;;  %v1391_v42 = vld [vmem:[%s3348_s12] sm:$0xff] }
 0x38b   : > { %1411 = vmatpush.msrb.mxu2 %v1391_v42 }
 0x3eb   : > { %v1170_v43 = vpop.xlane.xlu2 %1169 }
 0x3ec   : > { %v1171_v44 = vsub.f32 %v1165_v38, %v1170_v43  ;;  %v2289_v43 = vld [vmem:[%s3348_s12 + $0x8] sm:$0xff] }
 0x3ee   : > { %v1172_v45 = vmul.f32 1.442695, %v1171_v44 }
 0x3f0   : > { %2525 = vpow2.f32 %v1172_v45 }
 0x3f6   : > { %v2526_v46 = vpop.eup %2525 }
 0x3f7   : > { %v1174_v47 = vsel %vm984_vm2, %v2526_v46, 0.0 }
 0x3f8   : > { %1175 = vadd.xlane.f32.xlu0 %v1174_v47 }
 0x405   : > { %v1136_v49 = vpop.f32.mrf.mxu2 }
 0x406   : > { %v1139_v50 = vadd.f32 %v1136_v49, %v1047_v48 }
 0x40d   : > { %v1257_v51 = vpop.f32.mrf.mxu2 }
 0x40e   : > { %v1260_v52 = vsel %vm984_vm2, %v1257_v51, -inf }
 0x40f   : > { %1261 = vmax.xlane.f32.xlu1 %v1260_v52 }
 0x46b   : > { %v1176_v54 = vpop.xlane.xlu0 %1175 }
 0x46c   : > { %2527 = vrcp.f32 %v1176_v54 }
 0x472   : > { %v2528_v55 = vpop.eup %2527 }
 0x473   : > { %v1178_v56 = vmul.f32 %v2528_v55, %v2526_v46 }
 0x475   : > { %2273 = vst.msk [vmem:[%s3401_s11 + $0x10] sm:$0xff] %vm984_vm2, %v1178_v56  ;;  %2275 = vmatmul.msk.f32.vlgmr.msrb.gmra.mxu1 %vm984_vm2, %v1178_v56  ;;  %v1392_v56 = vld [vmem:[%s3354_s13] sm:$0xff] }
 0x476   : > { %2286 = vmatpush.xpose.msk.msra.mxu0 %vm984_vm2, %v1392_v56  ;;  %v1788_v56 = vld [vmem:[#allocation14 + $0x8] sm:$0xff] }
 0x482   : > { %v1262_v57 = vpop.xlane.xlu1 %1261 }
 0x483   : > { %v1263_v58 = vsub.f32 %v1257_v51, %v1262_v57 }
 0x485   : > { %v1264_v59 = vmul.f32 1.442695, %v1263_v58 }
 0x487   : > { %2529 = vpow2.f32 %v1264_v59 }
 0x48d   : > { %v2530_v60 = vpop.eup %2529 }
 0x48e   : > { %v1266_v61 = vsel %vm984_vm2, %v2530_v60, 0.0 }
 0x48f   : > { %1267 = vadd.xlane.f32.xlu0 %v1266_v61 }
 0x4f2   : > { %v1204_v0 = vpop.f32.mrf.mxu1 }
 0x4f3   : > { %2276 = vmatmul.msk.f32.vlgmr.msra.gmra.mxu3 %vm960_vm1, %v1204_v0 }
 0x4f4   : > { %1502 = vmatpush.msra.mxu3 %v2289_v43 }
 0x502   : > { %v1268_v1 = vpop.xlane.xlu0 %1267 }
 0x503   : > { %2531 = vrcp.f32 %v1268_v1  ;;  %v2290_v1 = vld [vmem:[%s3354_s13 + $0x8] sm:$0xff] }
 0x504   : > { %2533 = vrcp.f32 %v3007_v11  ;;  %2293 = vmatpush.xpose.msk.msra.mxu2 %vm984_vm2, %v2290_v1  ;;  %v1822_v1 = vld [vmem:[%s3743_s20 + $0x18] sm:$0xff] }
 0x509   : > { %v2532_v2 = vpop.eup %2531 }
 0x50a   : > { %v1270_v3 = vmul.f32 %v2532_v2, %v2530_v60  ;;  %v2534_v12 = vpop.eup %2533  ;;  %v1454_v2 = vld [vmem:[#allocation13] sm:$0xff] }
 0x50b   : > { %v1330_v13 = vmul.f32 32.0, %v2534_v12  ;;  %vm1334_vm3 = vweird.f32 %v2534_v12  ;;  %1473 = vmatpush.msrb.mxu1 %v1454_v2 }
 0x50c   : > { %2280 = vst.msk [vmem:[%s3401_s11 + $0x18] sm:$0xff] %vm984_vm2, %v1270_v3  ;;  %2282 = vmatmul.msk.f32.vlgmr.msrb.gmra.mxu0 %vm984_vm2, %v1270_v3  ;;  %v2296_v3 = vld [vmem:[%s3348_s12 + $0x10] sm:$0xff] }
 0x50d   : > { %v1331_v14 = vsub.f32 1.0, %v1330_v13  ;;  %1565 = vmatpush.msrb.mxu0 %v1546_v4 }
 0x50f   : > { %v1332_v15 = vmul.f32 %v2534_v12, %v1331_v14 }
 0x511   : > { %v1333_v16 = vadd.f32 %v2534_v12, %v1332_v15 }
 0x513   : > { %v3437_v17 = vsel %vm1334_vm3, %v2534_v12, %v1333_v16 }
 0x576   : > { %v1228_v6 = vpop.f32.mrf.mxu3 }
 0x577   : > { %v1231_v7 = vadd.f32 %v1228_v6, %v1139_v50 }
 0x589   : > { %v1296_v5 = vpop.f32.mrf.mxu0 }
 0x58a   : > { %2283 = vmatmul.msk.f32.vlgmr.msra.gmra.mxu1 %vm960_vm1, %v1296_v5 }
 0x58b   : > { %1594 = vmatpush.msra.mxu1 %v2296_v3 }
 0x607   : > { %v1320_v8 = vpop.f32.mrf.mxu1 }
 0x608   : > { %v1323_v9 = vadd.f32 %v1320_v8, %v1231_v7 }
 0x60a   : > { %v1326_v10 = vsel %vm933_vm0, %v1323_v9, 0.0 }
 0x60b   : > { %1327 = vadd.xlane.f32.xlu0 %v1326_v10  ;;  %v2303_v10 = vld [vmem:[%s3348_s12 + $0x18] sm:$0xff]  ;;  %s3750_s12 = smov %s3749_s5 }
 0x60c   : > { %s2817_s14 = scalar_lea.hbm %s3750_s12, 128 }
 0x67e   : > { %v1328_v18 = vpop.xlane.xlu0 %1327 }
 0x67f   : > { %v1336_v19 = vmul.f32 %v3437_v17, %v1328_v18 }
 0x681   : > { %v1337_v20 = vsub.f32 %v1323_v9, %v1336_v19 }
 0x683   : > { %v1338_v21 = vmul.f32 %v1337_v20, %v1337_v20 }
 0x685   : > { %v1339_v22 = vsel %vm933_vm0, %v1338_v21, 0.0 }
 0x686   : > { %1340 = vadd.xlane.f32.xlu2 %v1339_v22 }
 0x6f9   : > { %v1341_v27 = vpop.xlane.xlu2 %1340 }
 0x6fa   : > { %v1342_v28 = vmul.f32 %v1341_v27, %v3437_v17  ;;  %v2297_v27 = vld [vmem:[%s3354_s13 + $0x10] sm:$0xff] }
 0x6fc   : > { %v1343_v29 = vadd.f32 1e-06, %v1342_v28 }
 0x6fe   : > { %2535 = vrsqrt.f32 %v1343_v29  ;;  %vm1350_vm5 = vweird.f32 %v1343_v29 }
 0x704   : > { %v2536_v30 = vpop.eup %2535 }
 0x705   : > { %v1345_v31 = vmul.f32 %v2536_v30, %v1343_v29  ;;  %vm1351_vm4 = vweird.f32 %v2536_v30 }
 0x706   : > { %vm1352_vm6 = vmor %vm1350_vm5, %vm1351_vm4 }
 0x707   : > { %v1346_v32 = vmul.f32 %v2536_v30, %v1345_v31 }
 0x709   : > { %v1347_v33 = vmul.f32 0.5, %v1346_v32 }
 0x70b   : > { %v1348_v34 = vsub.f32 1.5, %v1347_v33 }
 0x70d   : > { %v1349_v35 = vmul.f32 %v2536_v30, %v1348_v34 }
 0x70f   : > { %v1353_v37 = vsel %vm1352_vm6, %v2536_v30, %v1349_v35 }
 0x710   : > { %v1354_v38 = vmul.f32 %v1353_v37, %v1337_v20  ;;  %v1638_v37 = vld [vmem:[#allocation13 + $0x10] sm:$0xff] }
 0x712   : > { %v1358_v40 = vmul.f32 %v2509_v36, %v1354_v38  ;;  %v2304_v36 = vld [vmem:[%s3354_s13 + $0x18] sm:$0xff] }
 0x713   : > { %v1730_v38 = vld [vmem:[#allocation13 + $0x18] sm:$0xff] }
 0x714   : > { %v3448_v41 = vadd.f32 %v2510_v39, %v1358_v40 }
 0x716   : > { %2284 = vmatmul.msk.f32.vlgmr.msrb.gmra.mxu3 %vm933_vm0, %v3448_v41 }
 0x717   : > { %2300 = vmatpush.xpose.msk.msrb.mxu3 %vm984_vm2, %v2297_v27 }
 0x799   : > { %v1387_v44 = vpop.f32.mrf.mxu3 }
 0x79a   : > { %v1390_v45 = vmul.f32 0.35355338, %v1387_v44 }
 0x79c   : > { %1483 = vrot.lane.b32.xlu0 %v1390_v45, %s3004_s16  ;;  %2285 = vmatmul.msk.f32.vlgmr.msrb.gmra.mxu2 %vm960_vm1, %v1390_v45 }
 0x79d   : > { %1657 = vmatpush.msrb.mxu2 %v1638_v37 }
 0x7a4   : > { %1575 = vrot.lane.b32.xlu0 %v1390_v45, %s3006_s18 }
 0x80e   : > { %v1484_v46 = vpop.permute.xlu0 %1483 }
 0x80f   : > { %2291 = vmatmul.msk.f32.vlgmr.msra.gmra.mxu3 %vm960_vm1, %v1484_v46 }
 0x810   : > { %1749 = vmatpush.msra.mxu3 %v1730_v38 }
 0x816   : > { %v1576_v9 = vpop.permute.xlu0 %1575 }
 0x81f   : > { %v1413_v47 = vpop.f32.mrf.mxu2 }
 0x820   : > { %v1416_v48 = vsel %vm984_vm2, %v1413_v47, -inf }
 0x821   : > { %1417 = vmax.xlane.f32.xlu2 %v1416_v48 }
 0x892   : > { %v1504_v49 = vpop.f32.mrf.mxu3 }
 0x893   : > { %v1507_v50 = vsel %vm984_vm2, %v1504_v49, -inf }
 0x894   : > { %1508 = vmax.xlane.f32.xlu1 %v1507_v50  ;;  %v1418_v51 = vpop.xlane.xlu2 %1417 }
 0x895   : > { %v1419_v52 = vsub.f32 %v1413_v47, %v1418_v51 }
 0x897   : > { %v1420_v53 = vmul.f32 1.442695, %v1419_v52 }
 0x899   : > { %2537 = vpow2.f32 %v1420_v53 }
 0x89f   : > { %v2538_v54 = vpop.eup %2537 }
 0x8a0   : > { %v1422_v55 = vsel %vm984_vm2, %v2538_v54, 0.0 }
 0x8a1   : > { %1423 = vadd.xlane.f32.xlu2 %v1422_v55  ;;  %v1789_v55 = vld [vmem:[#allocation14 + $0x10] sm:$0xff] }
 0x8b9   : > { %1667 = vrot.lane.b32.xlu2 %v1390_v45, %s3005_s6  ;;  %s1929_s6 = sshll.u32 %s3401_s11, 4  ;;  %s1930_s6 = int_to_ptr.vmem [resolvable:$true] %s1929_s6 }
 0x907   : > { %v1509_v57 = vpop.xlane.xlu1 %1508 }
 0x908   : > { %v1510_v58 = vsub.f32 %v1504_v49, %v1509_v57  ;;  %v1787_v57 = vld [vmem:[#allocation14] sm:$0xff] }
 0x90a   : > { %v1511_v59 = vmul.f32 1.442695, %v1510_v58  ;;  %v1826_v58 = vld [vmem:[%s3743_s20 + $0x38] sm:$0xff] }
 0x90c   : > { %2539 = vpow2.f32 %v1511_v59  ;;  %v1825_v59 = vld [vmem:[%s3743_s20 + $0x30] sm:$0xff] }
 0x912   : > { %v2540_v60 = vpop.eup %2539 }
 0x913   : > { %v1513_v61 = vsel %vm984_vm2, %v2540_v60, 0.0 }
 0x914   : > { %1514 = vadd.xlane.f32.xlu1 %v1513_v61  ;;  %v1424_v62 = vpop.xlane.xlu2 %1423 }
 0x915   : > { %2541 = vrcp.f32 %v1424_v62 }
 0x91b   : > { %v2542_v63 = vpop.eup %2541 }
 0x91c   : > { %v1426_v0 = vmul.f32 %v2542_v63, %v2538_v54  ;;  %v1668_v13 = vpop.permute.xlu2 %1667  ;;  %v1790_v54 = vld [vmem:[#allocation14 + $0x18] sm:$0xff]  ;;  %v1823_v63 = vld [vmem:[%s3743_s20 + $0x20] sm:$0xff] }
 0x91e   : > { %1427 = vst.msk [vmem:[%s3467_s23] sm:$0xff] %vm984_vm2, %v1426_v0  ;;  %2287 = vmatmul.msk.f32.vlgmr.msra.gmra.mxu0 %vm984_vm2, %v1426_v0 }
 0x91f   : > { %1686 = vmatpush.msra.mxu0 %v2303_v10 }
 0x987   : > { %v1515_v5 = vpop.xlane.xlu1 %1514 }
 0x988   : > { %2543 = vrcp.f32 %v1515_v5 }
 0x98e   : > { %v2544_v6 = vpop.eup %2543 }
 0x98f   : > { %v1517_v7 = vmul.f32 %v2544_v6, %v2540_v60  ;;  %v1824_v60 = vld [vmem:[%s3743_s20 + $0x28] sm:$0xff] }
 0x991   : > { %2292 = vst.msk [vmem:[%s3467_s23 + $0x8] sm:$0xff] %vm984_vm2, %v1517_v7  ;;  %2294 = vmatmul.msk.f32.vlgmr.msra.gmra.mxu2 %vm984_vm2, %v1517_v7 }
 0x992   : > { %1810 = vmatpush.msra.mxu2 %v1790_v54 }
 0x994   : > { %1811 = vmatpush.msra.mxu2 %v1789_v55 }
 0x996   : > { %1812 = vmatpush.msra.mxu2 %v1788_v56 }
 0x998   : > { %1813 = vmatpush.msra.mxu2 %v1787_v57 }
 0x99b   : > { %v1451_v8 = vpop.f32.mrf.mxu0 }
 0x99c   : > { %2288 = vmatmul.msk.f32.vlgmr.msrb.gmra.mxu1 %vm960_vm1, %v1451_v8  ;;  %v2511_v8 = vld [vmem:[%s3744_s21] ss:$0 sm:$0xff]  ;;  %s2317_s21 = sshll.u32 %s2983_s0, 3 }
 0x99d   : > { %2307 = vmatpush.xpose.msk.msrb.mxu1 %vm984_vm2, %v2304_v36  ;;  %s1926_s18 = sadd.s32 %s2979_s29, %s2317_s21 }
 0x99e   : > { %s2318_s17 = sshll.u32 %s1926_s18, 3 }
 0x99f   : > { %s1928_s13 = scalar_lea.hbm %s3749_s5, %s2318_s17 }
 0x9a0   : > { %s1931_s27 = sshll.u32 %s1928_s13, 4  ;;  %s1932_s27 = int_to_ptr.hbm [resolvable:$true] %s1931_s27 }
 0x9a1   : > { %s2811_s30 = sshra.s32 %s1932_s27, 4  ;;  %s2812_s30 = int_to_ptr.hbm [resolvable:$true] %s2811_s30 }
 0x9a2   : > { %s2813_s2 = scalar_lea.hbm %s2812_s30, 32  ;;  %p2818_p3 = scmp.lt.s32.totalorder %s2812_s30, %s3750_s12 }
 0x9a3   : > { %p2814_p0 = scmp.ne.s32.totalorder %s2812_s30, %s2813_s2  ;;  %p2819_p4 = scmp.lt.s32.totalorder %s2817_s14, %s2813_s2 }
 0x9a4   : > { %2298 = vmatmul.msk.f32.vlgmr.msra.gmra.mxu1 %vm960_vm1, %v1576_v9 }
 0x9a5   : > { %p2815_p1 = pnand %p2814_p0, %p3189_p6  ;;  %p2820_p5 = por %p2819_p4, %p2818_p3 }
 0x9a7   : > { %p2816_p2 = pneg %p2815_p1 }
 0x9a9   : > { %p2821_p7 = pnand %p2820_p5, %p2816_p2 }
 0xa14   : > { %v1543_v11 = vpop.f32.mrf.mxu2 }
 0xa15   : > { %2295 = vmatmul.msk.f32.vlgmr.msrb.gmra.mxu0 %vm960_vm1, %v1543_v11  ;;  %v2512_v11 = vld [vmem:[%s3745_s26] ss:$0 sm:$0xff] }
 0xa16   : > { %1843 = vmatpush.msrb.mxu0 %v1826_v58 }
 0xa18   : > { %1844 = vmatpush.msrb.mxu0 %v1825_v59 }
 0xa19   : > { %v1475_v12 = vpop.f32.mrf.mxu1 }
 0xa1a   : > { %v1478_v16 = vadd.f32 %v1475_v12, %v3448_v41  ;;  %1845 = vmatpush.msrb.mxu0 %v1824_v60 }
 0xa1c   : > { %1846 = vmatpush.msrb.mxu0 %v1823_v63 }
 0xa1d   : > { %2305 = vmatmul.msk.f32.vlgmr.msra.gmra.mxu0 %vm960_vm1, %v1668_v13 }
 0xa1e   : > { %1847 = vmatpush.msrb.mxu0 %v1822_v1 }
 0xa21   : > { %v1596_v14 = vpop.f32.mrf.mxu1 }
 0xa22   : > { %v1599_v15 = vsel %vm984_vm2, %v1596_v14, -inf }
 0xa23   : > { %1600 = vmax.xlane.f32.xlu1 %v1599_v15  ;;  %v1820_v15 = vld [vmem:[%s3743_s20 + $0x8] sm:$0xff] }
 0xa92   : > { %v1567_v18 = vpop.f32.mrf.mxu0 }
 0xa93   : > { %v1570_v19 = vadd.f32 %v1567_v18, %v1478_v16  ;;  %v1819_v16 = vld [vmem:[%s3743_s20] sm:$0xff] }
 0xa94   : > { %v2513_v18 = vld [vmem:[%s3746_s24] ss:$0 sm:$0xff] }
 0xa96   : > { %v1601_v20 = vpop.xlane.xlu1 %1600 }
 0xa97   : > { %v1602_v21 = vsub.f32 %v1596_v14, %v1601_v20  ;;  %v1821_v14 = vld [vmem:[%s3743_s20 + $0x10] sm:$0xff] }
 0xa98   : > { %1848 = vmatpush.msrb.mxu0 %v1821_v14 }
 0xa99   : > { %v1603_v22 = vmul.f32 1.442695, %v1602_v21 }
 0xa9a   : > { %v1688_v23 = vpop.f32.mrf.mxu0  ;;  %1849 = vmatpush.msrb.mxu0 %v1820_v15 }
 0xa9b   : > { %2545 = vpow2.f32 %v1603_v22  ;;  %v1691_v24 = vsel %vm984_vm2, %v1688_v23, -inf  ;;  %v2514_v22 = vld [vmem:[%s3747_s19] ss:$0 sm:$0xff] }
 0xa9c   : > { %1692 = vmax.xlane.f32.xlu0 %v1691_v24  ;;  %1850 = vmatpush.msrb.mxu0 %v1819_v16 }
 0xaa1   : > { %v2546_v25 = vpop.eup %2545 }
 0xaa2   : > { %v1605_v26 = vsel %vm984_vm2, %v2546_v25, 0.0 }
 0xaa3   : > { %1606 = vadd.xlane.f32.xlu1 %v1605_v26 }
 0xb0f   : > { %v1693_v28 = vpop.xlane.xlu0 %1692 }
 0xb10   : > { %v1694_v29 = vsub.f32 %v1688_v23, %v1693_v28 }
 0xb12   : > { %v1695_v30 = vmul.f32 1.442695, %v1694_v29 }
 0xb14   : > { %2547 = vpow2.f32 %v1695_v30 }
 0xb16   : > { %v1607_v31 = vpop.xlane.xlu1 %1606 }
 0xb17   : > { %2549 = vrcp.f32 %v1607_v31 }
 0xb1a   : > { %v2548_v32 = vpop.eup %2547 }
 0xb1b   : > { %v1697_v33 = vsel %vm984_vm2, %v2548_v32, 0.0 }
 0xb1c   : > { %1698 = vadd.xlane.f32.xlu1 %v1697_v33 }
 0xb1d   : > { %v2550_v34 = vpop.eup %2549 }
 0xb1e   : > { %v1609_v35 = vmul.f32 %v2550_v34, %v2546_v25 }
 0xb20   : > { %2299 = vst.msk [vmem:[%s3467_s23 + $0x10] sm:$0xff] %vm984_vm2, %v1609_v35  ;;  %2301 = vmatmul.msk.f32.vlgmr.msrb.gmra.mxu3 %vm984_vm2, %v1609_v35 }
 0xb8f   : > { %v1699_v39 = vpop.xlane.xlu1 %1698 }
 0xb90   : > { %2551 = vrcp.f32 %v1699_v39 }
 0xb96   : > { %v2552_v40 = vpop.eup %2551 }
 0xb97   : > { %v1701_v41 = vmul.f32 %v2552_v40, %v2548_v32 }
 0xb99   : > { %2306 = vst.msk [vmem:[%s3467_s23 + $0x18] sm:$0xff] %vm984_vm2, %v1701_v41  ;;  %2308 = vmatmul.msk.f32.vlgmr.msrb.gmra.mxu1 %vm984_vm2, %v1701_v41 }
 0xba3   : > { %v1635_v42 = vpop.f32.mrf.mxu3 }
 0xba4   : > { %2302 = vmatmul.msk.f32.vlgmr.msrb.gmra.mxu2 %vm960_vm1, %v1635_v42 }
 0xc16   : > { %v1727_v43 = vpop.f32.mrf.mxu1 }
 0xc17   : > { %2309 = vmatmul.msk.f32.vlgmr.msra.gmra.mxu3 %vm960_vm1, %v1727_v43 }
 0xc27   : > { %v1659_v44 = vpop.f32.mrf.mxu2 }
 0xc28   : > { %v1662_v45 = vadd.f32 %v1659_v44, %v1570_v19 }
 0xc9a   : > { %v1751_v46 = vpop.f32.mrf.mxu3 }
 0xc9b   : > { %v1754_v47 = vadd.f32 %v1751_v46, %v1662_v45 }
 0xc9d   : > { %v1757_v48 = vsel %vm933_vm0, %v1754_v47, 0.0 }
 0xc9e   : > { %1758 = vadd.xlane.f32.xlu2 %v1757_v48 }
 0xd11   : > { %v1759_v49 = vpop.xlane.xlu2 %1758 }
 0xd12   : > { %v1760_v50 = vmul.f32 %v1759_v49, %v3437_v17 }
 0xd14   : > { %v1761_v51 = vsub.f32 %v1754_v47, %v1760_v50 }
 0xd16   : > { %v1762_v52 = vmul.f32 %v1761_v51, %v1761_v51 }
 0xd18   : > { %v1763_v53 = vsel %vm933_vm0, %v1762_v52, 0.0 }
 0xd19   : > { %1764 = vadd.xlane.f32.xlu1 %v1763_v53 }
 0xd8c   : > { %v1765_v61 = vpop.xlane.xlu1 %1764 }
 0xd8d   : > { %v1766_v62 = vmul.f32 %v1765_v61, %v3437_v17 }
 0xd8f   : > { %v1767_v0 = vadd.f32 1e-06, %v1766_v62 }
 0xd91   : > { %2553 = vrsqrt.f32 %v1767_v0  ;;  %vm1774_vm8 = vweird.f32 %v1767_v0 }
 0xd97   : > { %v2554_v2 = vpop.eup %2553 }
 0xd98   : > { %v1769_v3 = vmul.f32 %v2554_v2, %v1767_v0  ;;  %vm1775_vm7 = vweird.f32 %v2554_v2 }
 0xd99   : > { %vm1776_vm9 = vmor %vm1774_vm8, %vm1775_vm7 }
 0xd9a   : > { %v1770_v4 = vmul.f32 %v2554_v2, %v1769_v3 }
 0xd9c   : > { %v1771_v5 = vmul.f32 0.5, %v1770_v4 }
 0xd9e   : > { %v1772_v6 = vsub.f32 1.5, %v1771_v5 }
 0xda0   : > { %v1773_v7 = vmul.f32 %v2554_v2, %v1772_v6 }
 0xda2   : > { %v1777_v9 = vsel %vm1776_vm9, %v2554_v2, %v1773_v7 }
 0xda3   : > { %v1778_v10 = vmul.f32 %v1777_v9, %v1761_v51 }
 0xda5   : > { %v1782_v12 = vmul.f32 %v2511_v8, %v1778_v10 }
 0xda7   : > { %v1786_v13 = vadd.f32 %v2512_v11, %v1782_v12 }
 0xda9   : > { %2310 = vmatmul.msk.f32.vlgmr.msra.gmra.mxu2 %vm933_vm0, %v1786_v13 }
 0xe2c   : > { %v1815_v19 = vpop.f32.mrf.mxu2 }
 0xe2d   : > { %v1816_v20 = vadd.f32 %v2513_v18, %v1815_v19 }
 0xe2f   : > { %v1818_v21 = vmax.f32 %v1816_v20, 0.0 }
 0xe31   : > { %2311 = vmatmul.msk.f32.vlgmr.msrb.gmra.mxu0 %vm1831_vm10, %v1818_v21 }
 0xeae   : > { %v1852_v23 = vpop.f32.mrf.mxu0 }
 0xeaf   : > { %v1853_v24 = vadd.f32 %v2514_v22, %v1852_v23 }
 0xeb1   : > { %v1855_v25 = vadd.f32 %v1853_v24, %v1786_v13 }
 0xeb3   : > { %v1858_v26 = vsel %vm933_vm0, %v1855_v25, 0.0 }
 0xeb4   : > { %1859 = vadd.xlane.f32.xlu1 %v1858_v26 }
 0xf27   : > { %v1860_v27 = vpop.xlane.xlu1 %1859 }
 0xf28   : > { %v1861_v28 = vmul.f32 %v1860_v27, %v3437_v17 }
 0xf2a   : > { %v3543_v29 = vsub.f32 %v1855_v25, %v1861_v28 }
 0xf2c   : > { %v1863_v30 = vmul.f32 %v3543_v29, %v3543_v29 }
 0xf2e   : > { %v1864_v31 = vsel %vm933_vm0, %v1863_v30, 0.0 }
 0xf2f   : > { %1865 = vadd.xlane.f32.xlu1 %v1864_v31 }
 0xf30   : > { %2824 = shalt.err (!%p2821_p7)
}
 0xf31   : > { %s3008_s22 = smov 128   ;;  %s3009_s10 = smov 256  }
 0xf32   : > { %s3010_s21 = smov 8   ;;  %s3751_s4 = sld [smem:[#allocation57_spill]] }
 0xf33   : > { %2354 = dma.vmem_to_hbm [thread:$0]  (%p3189_p6), %s1930_s6, 512, %s1932_s27, %s3556_s9, %s3008_s22, %s3009_s10, %s3010_s21  }
 0xf34   : > { %s1947_s11 = sshll.u32 %s3467_s23, 4  ;;  %s1948_s11 = int_to_ptr.vmem [resolvable:$true] %s1947_s11 }
 0xf38   : > { %s3752_s13 = smov %s3751_s4  ;;  %s1946_s5 = scalar_lea.hbm %s3751_s4, %s2318_s17 }
 0xf39   : > { %s1949_s24 = sshll.u32 %s1946_s5, 4  ;;  %s2845_s19 = scalar_lea.hbm %s3752_s13, 128  ;;  %s1950_s24 = int_to_ptr.hbm [resolvable:$true] %s1949_s24 }
 0xf3a   : > { %s2839_s30 = sshra.s32 %s1950_s24, 4  ;;  %s2840_s30 = int_to_ptr.hbm [resolvable:$true] %s2839_s30 }
 0xf3b   : > { %s2841_s2 = scalar_lea.hbm %s2840_s30, 32  ;;  %p2846_p9 = scmp.lt.s32.totalorder %s2840_s30, %s3752_s13 }
 0xf3c   : > { %p2842_p10 = scmp.ne.s32.totalorder %s2840_s30, %s2841_s2  ;;  %p2847_p11 = scmp.lt.s32.totalorder %s2845_s19, %s2841_s2 }
 0xf3e   : > { %p2843_p12 = pnand %p2842_p10, %p3189_p6  ;;  %p2848_p0 = por %p2847_p11, %p2846_p9 }
 0xf40   : > { %p2844_p13 = pneg %p2843_p12 }
 0xf42   : > { %p2849_p1 = pnand %p2848_p0, %p2844_p13 }
 0xf44   : > { %2852 = shalt.err (!%p2849_p1)
}
 0xf45   : > { %2355 = dma.vmem_to_hbm [thread:$0]  (%p3189_p6), %s1948_s11, 512, %s1950_s24, %s3556_s9, %s3008_s22, %s3009_s10, %s3010_s21  }
 0xf46   : > { %s2315_s23 = sshll.u32 %s2983_s0, 1  ;;  %s2251_s18 = sshll.u32 %s3396_s15, 3 }
 0xf47   : > { %s1910_s17 = sadd.s32 %s2979_s29, %s2315_s23  ;;  %s3753_s22 = sld [smem:[#allocation53_spill]] }
 0xf48   : > { %s2316_s26 = sshll.u32 %s1910_s17, 3  ;;  %s3754_s5 = sld [smem:[#allocation55_spill]] }
 0xf49   : > { %s3756_s30 = sld [smem:[#allocation54_spill]]  ;;  %s900_s2 = scalar_lea.vmem [#allocation16], %s2251_s18 }
 0xf4a   : > { %s1914_s14 = sshll.u32 %s900_s2, 4  ;;  %s1890_s19 = scalar_lea.sflag [#allocation4], %s3396_s15  ;;  %s1915_s14 = int_to_ptr.vmem [resolvable:$true] %s1914_s14 }
 0xf4d   : > { %v2515_v41 = vld [vmem:[%s3753_s22] ss:$0 sm:$0xff] }
 0xf4e   : > { %s3755_s11 = smov %s3754_s5  ;;  %s1912_s24 = scalar_lea.hbm %s3754_s5, %s2316_s26 }
 0xf4f   : > { %v2516_v43 = vld [vmem:[%s3756_s30] ss:$0 sm:$0xff]  ;;  %s1916_s1 = sshll.u32 %s1912_s24, 4  ;;  %s2873_s18 = scalar_lea.hbm %s3755_s11, 32  ;;  %s1917_s1 = int_to_ptr.hbm [resolvable:$true] %s1916_s1 }
 0xf50   : > { %s2867_s6 = sshra.s32 %s1917_s1, 4  ;;  %s2868_s6 = int_to_ptr.hbm [resolvable:$true] %s2867_s6 }
 0xf51   : > { %s2869_s27 = scalar_lea.hbm %s2868_s6, 8  ;;  %p2874_p5 = scmp.lt.s32.totalorder %s2868_s6, %s3755_s11 }
 0xf52   : > { %p2870_p2 = scmp.ne.s32.totalorder %s2868_s6, %s2869_s27  ;;  %p2875_p7 = scmp.lt.s32.totalorder %s2873_s18, %s2869_s27 }
 0xf54   : > { %p2871_p3 = pnand %p2870_p2, %p3189_p6  ;;  %p2876_p10 = por %p2875_p7, %p2874_p5 }
 0xf56   : > { %p2872_p4 = pneg %p2871_p3 }
 0xf58   : > { %p2877_p12 = pnand %p2876_p10, %p2872_p4 }
 0xfa2   : > { %v1866_v32 = vpop.xlane.xlu1 %1865 }
 0xfa3   : > { %v1867_v33 = vmul.f32 %v1866_v32, %v3437_v17 }
 0xfa5   : > { %v1868_v34 = vadd.f32 1e-06, %v1867_v33 }
 0xfa7   : > { %2555 = vrsqrt.f32 %v1868_v34  ;;  %vm1875_vm12 = vweird.f32 %v1868_v34 }
 0xfad   : > { %v2556_v35 = vpop.eup %2555 }
 0xfae   : > { %v1870_v36 = vmul.f32 %v2556_v35, %v1868_v34  ;;  %vm1876_vm11 = vweird.f32 %v2556_v35 }
 0xfaf   : > { %vm1877_vm13 = vmor %vm1875_vm12, %vm1876_vm11 }
 0xfb0   : > { %v1871_v37 = vmul.f32 %v2556_v35, %v1870_v36 }
 0xfb2   : > { %v1872_v38 = vmul.f32 0.5, %v1871_v37 }
 0xfb4   : > { %v1873_v39 = vsub.f32 1.5, %v1872_v38 }
 0xfb6   : > { %v1874_v40 = vmul.f32 %v2556_v35, %v1873_v39 }
 0xfb8   : > { %v1878_v17 = vsel %vm1877_vm13, %v2556_v35, %v1874_v40 }
 0xfb9   : > { %v1879_v42 = vmul.f32 %v1878_v17, %v3543_v29 }
 0xfbb   : > { %v1883_v44 = vmul.f32 %v2515_v41, %v1879_v42 }
 0xfbd   : > { %v1887_v45 = vadd.f32 %v2516_v43, %v1883_v44 }
 0xfbf   : > { %1888 = vst.msk [vmem:[%s900_s2] sm:$0xff] %vm933_vm0, %v1887_v45 }
 0xfc0   : > { %2880 = shalt.err (!%p2877_p12)
}
 0xfc1   : > { %2353 = dma.vmem_to_hbm [thread:$0]  (%p3189_p6), %s1915_s14, 128, %s1917_s1, %s1890_s19  }
 0xfc2 PF: > { %s3757_s15 = sld [smem:[#allocation31_spill]] }
 0xfc3   : > { %s3758_s9 = sld [smem:[#allocation27_spill]] }
 0xfc8   : > { %p2406_p13 = scmp.ge.s32.totalorder %s3757_s15, 2 }
 0xfc9   : > { %s1964_s10 = sand.u32 1, %s3758_s9  }
 0xfca   : > { %p2386_p9 = pnand %p2406_p13, %p3194_p8  ;;  %s1965_s21 = scalar_lea.sflag [#allocation4], %s1964_s10 }
 0xfcc   : > { %p2387_p11 = pneg %p2386_p9 }
 0xfce   : > { %2946 = dma.done.wait (%p2387_p11), %s1965_s21, 128  }
 0xfcf   : > { %2948 = vsyncadd (%p2387_p11), %s1965_s21, 4294967168  ;;  %s3760_s5 = sadd.s32 4294967294, %s3757_s15  }
 0xfd0   : > { %s1974_s24 = sand.u32 1, %s3760_s5  }
 0xfd1   : > { %s1975_s29 = scalar_lea.sflag [#allocation18], %s1974_s24 }
 0xfd2   : > { %2950 = dma.done.wait (%p2387_p11), %s1975_s29, 1024  }
 0xfd3   : > { %2952 = vsyncadd (%p2387_p11), %s1975_s29, 4294966272  ;;  %s47_s5 = sadd.s32 1, %s3757_s15   ;;  %s3761_s16 = sld [smem:[#allocation28_spill]] }
 0xfd4   : > { %p44_p6 = scmp.ge.s32.totalorder %s47_s5, 6   ;;  %s3762_s26 = sld [smem:[#allocation37_spill]] }
 0xfd5   : > { %s3763_s0 = sld [smem:[#allocation36_spill]]  ;;  %s3768_s2 = smov %s2959_s25 }
 0xfd6   : > { %s3764_s29 = sld [smem:[#allocation29_spill]]  ;;  %s3770_s27 = smov %s2971_s3 }
 0xfd7   : > { %s3765_s30 = sld [smem:[#allocation30_spill]]  ;;  %s3771_s3 = smov %s2975_s28 }
 0xfd8   : > { %s3766_s4 = sld [smem:[#allocation34_spill]] }
 0xfd9   : > { %s3767_s14 = sld [smem:[#allocation35_spill]]  ;;  %s3769_s25 = smov %s3761_s16 }
 0xfdb   : > { %s3772_s28 = smov %s3763_s0  ;;  %46 = sbr.rel (!%p44_p6) target bundleno = 37 (0x25), region = 241 }
 0xfdd   : > { %s3773_s0 = smov %s3765_s30 }
 0xfdf   : > { %s3774_s30 = smov %s3767_s14 }
 0xfe0   :  { %1991 = vsyncpa [#allocation3], 1 }
 0xfe1   :  { %1993 = vsyncpa [#allocation3 + $0x1], 1 }
 0xfe2   :  { %1994 = vsyncpa [#allocation6], 1 }
 0xfe3   :  { %1996 = vsyncpa [#allocation6 + $0x1], 1 }
 0xfe4   :  { %1997 = vsyncpa [#allocation9], 1 }
 0xfe5   :  { %1998 = vsyncpa [#allocation12], 1 }
 0xfe6   :  { %1999 = vsyncpa [#allocation15], 1 }
 0xfe7   :  { %2000 = vsyncpa [#allocation4], 1 }
 0xfe8   :  { %2002 = vsyncpa [#allocation4 + $0x1], 1 }
 0xfe9   :  { %2003 = vsyncpa [#allocation18], 1 }
 0xfea   :  { %2005 = vsyncpa [#allocation18 + $0x1], 1 }

</bundles_post_ra>
